<compile_context>
chip_gen: v6e
topology: v6e:2x2x1
jax: 0.10.0
libtpu: 0.0.40
codegen_flags: <defaults>
</compile_context>

<pallas_src>
import functools

import jax
import jax.numpy as jnp
from jax.experimental import pallas as pl
from jax.experimental.pallas import tpu as pltpu

EPS = 1e-5


# ----------------------------- phase decomposition ---------------------------

def _phase_taps(ph, pw):
    """Taps used by output phase (oh%2==ph, ow%2==pw) for kernel=4, stride=2, pad=1.

    Returns [(kh, kw, dr, dc)]: ConvTranspose2d weight index (kh, kw) and input offset
    (dr, dc) such that  out[2r+ph, 2c+pw] += x[r+dr, c+dc] * w[:, :, kh, kw].
    """
    khs, drs = ((1, 3), (0, -1)) if ph == 0 else ((0, 2), (1, 0))
    kws, dcs = ((1, 3), (0, -1)) if pw == 0 else ((0, 2), (1, 0))
    return [(khs[a], kws[b], drs[a], dcs[b]) for a in range(2) for b in range(2)]


def _build_merged_weights(weight, dtype):
    """(Cin, Cout, 4, 4) ConvTranspose2d weight -> (3, 4*Cout, 3*Cin) row-shift matrices.

    First index d = dr + 1 (input row shift).  Output rows are phase-major
    (p = 2*ph + pw) blocks of Cout; input columns are dc-major (dc + 1) blocks of Cin.
    Unused (phase, dr, dc) combinations are zero-filled; the extra zero FLOPs are free
    because 4*Cout is still far below the MXU height, while all phases now share the
    same RHS slices.
    """
    Cin, Cout = weight.shape[0], weight.shape[1]
    wm = jnp.zeros((3, 4 * Cout, 3 * Cin), jnp.float32)
    for ph in range(2):
        for pw in range(2):
            p = 2 * ph + pw
            for (kh, kw, dr, dc) in _phase_taps(ph, pw):
                blk = weight[:, :, kh, kw].T.astype(jnp.float32)       # (Cout, Cin)
                wm = wm.at[dr + 1,
                           p * Cout:(p + 1) * Cout,
                           (dc + 1) * Cin:(dc + 2) * Cin].set(blk)
    return wm.astype(dtype)


# --------------------------------- kernel ------------------------------------

def _upconv_kernel(x_ref, gamma_ref, beta_ref, gmap_ref, wm_ref, bias_ref, mask_ref,
                   o_ref, xpad_ref, *, H, W, num_groups, activation, do_norm, nb):
    Cin = x_ref.shape[1]
    S = H * W                          # lane-dense spatial axis
    C3 = xpad_ref.shape[0]             # 3 * Cin (dc = -1 / 0 / +1 copies)
    cdt = xpad_ref.dtype               # MXU operand dtype (bf16)

    # Row-shift halo: W zero lanes on each side so dr = +-1 taps of out-of-image rows
    # read exact zeros.  (Data region is fully rewritten per sample below.)
    xpad_ref[:, 0:W] = jnp.zeros((C3, W), cdt)
    xpad_ref[:, W + S:S + 2 * W] = jnp.zeros((C3, W), cdt)

    m_neg = mask_ref[0:1, :]           # (1, S): 1 where column c-1 exists (w >= 1)
    m_pos = mask_ref[1:2, :]           # (1, S): 1 where column c+1 exists (w <= W-2)
    gamma = gamma_ref[...].astype(jnp.float32)          # (Cin, 1)
    beta = beta_ref[...].astype(jnp.float32)            # (Cin, 1)
    bias = bias_ref[...]                                # (4*Cout, 1) f32, phase-major

    for b in range(nb):                # samples packed into this grid step (unrolled)
        xb = x_ref[b].astype(jnp.float32)               # (Cin, S)

        # ---- fused GroupNorm: full-width two-pass f32 stats; the per-group combine of
        #      per-channel sums is a tiny block-diagonal (Cin,Cin) x (Cin,1) matmul.
        if do_norm:
            inv_n = 1.0 / ((Cin // num_groups) * S)
            ch_sum = jnp.sum(xb, axis=1, keepdims=True)                      # (Cin, 1)
            mean_c = jnp.dot(gmap_ref[...], ch_sum,
                             preferred_element_type=jnp.float32) * inv_n     # (Cin, 1)
            xc = xb - mean_c
            ch_ss = jnp.sum(xc * xc, axis=1, keepdims=True)                  # (Cin, 1)
            var_c = jnp.dot(gmap_ref[...], ch_ss,
                            preferred_element_type=jnp.float32) * inv_n      # (Cin, 1)
            xn = xc * (jax.lax.rsqrt(var_c + EPS) * gamma) + beta            # (Cin, S)
        else:
            xn = xb

        # ---- three column-shifted copies (dc in {-1, 0, +1}) stacked along sublanes;
        #      only 2 mask multiplies per sample, every tap below is a pure stride-W
        #      (row-shift) slice of this buffer.
        xpad_ref[Cin:2 * Cin, W:W + S] = xn.astype(cdt)                      # dc =  0
        xpad_ref[0:Cin, W:W + S] = (                                         # dc = -1
            xpad_ref[Cin:2 * Cin, W - 1:W - 1 + S] * m_neg)
        xpad_ref[2 * Cin:3 * Cin, W:W + S] = (                               # dc = +1
            xpad_ref[Cin:2 * Cin, W + 1:W + 1 + S] * m_pos)

        # ---- merged transposed conv: all 4 output phases share one (4*Cout, 3*Cin) LHS
        #      per row shift dr; RHS slices come straight from the halo buffer (no patch
        #      scratch store/reload in front of the MXU).
        acc = None
        for d in range(3):             # dr = d - 1
            rhs = xpad_ref[:, d * W:d * W + S]                               # (3*Cin, S)
            part = jnp.dot(wm_ref[d], rhs, preferred_element_type=jnp.float32)
            acc = part if acc is None else acc + part                        # (4*Cout, S)

        # ---- epilogue once per sample on the full phase-major slab; lane-dense store.
        z = acc + bias
        z = jnp.maximum(z, 0.0) if activation == "relu" else jnp.tanh(z)
        o_ref[b] = z.astype(o_ref.dtype)


# --------------------------------- wrapper -----------------------------------

def upconv_forward(x, gamma, beta, weight, bias, *, num_groups, activation="relu",
                   do_batch_norm=True, kernel=4, stride=2, padding=1,
                   mxu_dtype=jnp.bfloat16, samples_per_step=4):
    # NOTE: `do_batch_norm` actually gates GroupNorm (name kept to mirror the module).
    activation = activation.lower()
    if activation not in ("relu", "tanh"):
        raise NotImplementedError("`activation` must be `relu` or `tanh`")
    if not (kernel == 4 and stride == 2 and padding == 1):
        # TODO(synk): the phase decomposition is specialised to the module defaults.
        raise NotImplementedError("only kernel=4, stride=2, padding=1 is supported")

    N, Cin, H, W = x.shape
    Cout = weight.shape[1]
    S, Ho, Wo = H * W, 2 * H, 2 * W

    # Samples per grid step: amortise per-step overhead, but keep >= 2 grid steps when
    # possible so the "parallel" axis still feeds both v7x TensorCores.
    nb = 1
    for cand in range(1, min(N, samples_per_step) + 1):
        if N % cand == 0 and (N // cand >= 2 or N == 1):
            nb = cand

    # Host-side prep is weight/shape-sized; activation tensors only see free reshapes
    # here (the final NCHW de-interleave below is a pure layout transform).
    x2 = x.reshape(N, Cin, S)
    g2 = gamma.reshape(Cin, 1).astype(jnp.float32)
    b2 = beta.reshape(Cin, 1).astype(jnp.float32)
    grp = jnp.arange(Cin, dtype=jnp.int32) // (Cin // num_groups)
    gmap = (grp[:, None] == grp[None, :]).astype(jnp.float32)              # (Cin, Cin)
    wm = _build_merged_weights(weight, mxu_dtype)                          # (3, 4Cout, 3Cin)
    bias4 = jnp.tile(bias.astype(jnp.float32), 4).reshape(4 * Cout, 1)     # phase-major
    col = jnp.arange(S, dtype=jnp.int32) % W
    masks = jnp.stack([(col >= 1), (col <= W - 2)]).astype(mxu_dtype)      # (2, S)

    kernel_fn = functools.partial(
        _upconv_kernel, H=H, W=W, num_groups=num_groups,
        activation=activation, do_norm=do_batch_norm, nb=nb)

    phase_out = pl.pallas_call(
        kernel_fn,
        out_shape=jax.ShapeDtypeStruct((N, 4 * Cout, S), x.dtype),
        grid=(N // nb,),
        in_specs=[
            pl.BlockSpec((nb, Cin, S), lambda n: (n, 0, 0)),               # x
            pl.BlockSpec((Cin, 1), lambda n: (0, 0)),                      # gamma
            pl.BlockSpec((Cin, 1), lambda n: (0, 0)),                      # beta
            pl.BlockSpec((Cin, Cin), lambda n: (0, 0)),                    # group map
            pl.BlockSpec((3, 4 * Cout, 3 * Cin), lambda n: (0, 0, 0)),     # merged weights
            pl.BlockSpec((4 * Cout, 1), lambda n: (0, 0)),                 # bias (4 phases)
            pl.BlockSpec((2, S), lambda n: (0, 0)),                        # column masks
        ],
        out_specs=pl.BlockSpec((nb, 4 * Cout, S), lambda n: (n, 0, 0)),
        scratch_shapes=[pltpu.VMEM((3 * Cin, S + 2 * W), mxu_dtype)],      # halo buffer
        compiler_params=pltpu.CompilerParams(dimension_semantics=("parallel",)),
    )(x2, g2, b2, gmap, wm, bias4, masks)

    # Phase-major (N, [ph, pw, Cout], H*W) -> NCHW de-interleave: wrapper-side
    # reshape/transpose keeps the kernel's stores unmasked and lane-dense.
    out = phase_out.reshape(N, 2, 2, Cout, H, W)
    out = out.transpose(0, 3, 4, 1, 5, 2).reshape(N, Cout, Ho, Wo)
    return out


# -------------------------- pure-JAX references ------------------------------

def upconv_reference(x, gamma, beta, weight, bias, *, num_groups, activation="relu",
                     quantize_bf16=False):
    N, C, H, W = x.shape
    xg = x.reshape(N, num_groups, C // num_groups, H, W).astype(jnp.float32)
    mean = xg.mean(axis=(2, 3, 4), keepdims=True)
    var = xg.var(axis=(2, 3, 4), keepdims=True)
    xn = ((xg - mean) / jnp.sqrt(var + EPS)).reshape(N, C, H, W)
    xn = xn * gamma.reshape(1, C, 1, 1) + beta.reshape(1, C, 1, 1)
    w = weight
    if quantize_bf16:  # mimic the kernel's bf16 MXU operands (f32 accumulation)
        xn = xn.astype(jnp.bfloat16).astype(jnp.float32)
        w = w.astype(jnp.bfloat16).astype(jnp.float32)
    w_oihw = jnp.flip(w, axis=(2, 3)).transpose(1, 0, 2, 3)
    out = jax.lax.conv_general_dilated(
        xn, w_oihw, window_strides=(1, 1), padding=[(2, 2), (2, 2)],
        lhs_dilation=(2, 2), dimension_numbers=("NCHW", "OIHW", "NCHW"),
        precision=jax.lax.Precision.HIGHEST)
    out = out + bias.reshape(1, -1, 1, 1)
    return jnp.maximum(out, 0.0) if activation == "relu" else jnp.tanh(out)


if __name__ == "__main__":
    N, Cin, Cout, H, W = 2, 32, 16, 16, 16
    num_groups, K = 8, 4

    key = jax.random.PRNGKey(0)
    kx, kg, kb, kw, kbi = jax.random.split(key, 5)
    x = jax.random.normal(kx, (N, Cin, H, W), jnp.float32)
    gamma = 1.0 + 0.1 * jax.random.normal(kg, (Cin,), jnp.float32)
    beta = 0.1 * jax.random.normal(kb, (Cin,), jnp.float32)
    weight = 0.1 * jax.random.normal(kw, (Cin, Cout, K, K), jnp.float32)
    bias = 0.1 * jax.random.normal(kbi, (Cout,), jnp.float32)

    out = upconv_forward(x, gamma, beta, weight, bias,
                         num_groups=num_groups, activation="relu")
    out = jax.block_until_ready(out)
    assert out.shape == (N, Cout, 2 * H, 2 * W), out.shape

    ref_mixed = upconv_reference(x, gamma, beta, weight, bias, num_groups=num_groups,
                                 activation="relu", quantize_bf16=True)
    ref_f32 = upconv_reference(x, gamma, beta, weight, bias, num_groups=num_groups,
                               activation="relu", quantize_bf16=False)
    if not jnp.allclose(out, ref_mixed, atol=1e-2, rtol=1e-2):
        raise AssertionError("Pallas UpConv does not match the mixed-precision reference")
    if not jnp.allclose(out, ref_f32, atol=1e-1, rtol=1e-1):
        raise AssertionError("Pallas UpConv deviates too far from the f32 reference")

    print("KERNEL_OK")
</pallas_src>

<mosaic_0001>
module attributes {stable_mosaic.version = 11 : i64} {
  func.func @_upconv_kernel(%arg0: i32, %arg1: memref<1x32x256xf32, #tpu.memory_space<vmem>>, %arg2: memref<32x1xf32, #tpu.memory_space<vmem>>, %arg3: memref<32x1xf32, #tpu.memory_space<vmem>>, %arg4: memref<32x32xf32, #tpu.memory_space<vmem>>, %arg5: memref<3x64x96xbf16, #tpu.memory_space<vmem>>, %arg6: memref<64x1xf32, #tpu.memory_space<vmem>>, %arg7: memref<2x256xbf16, #tpu.memory_space<vmem>>, %arg8: memref<1x64x256xf32, #tpu.memory_space<vmem>>, %arg9: memref<96x288xbf16, #tpu.memory_space<vmem>>) attributes {dimension_semantics = [#tpu.dimension_semantics<parallel>], iteration_bounds = array<i64: 2>, scalar_prefetch = 0 : i64, scratch_operands = 1 : i64, tpu.core_type = #tpu.core_type<tc>, window_params = [{transform_indices = @transform_0, window_bounds = array<i64: 1, 32, 256>}, {pipeline_mode = #tpu.pipeline_mode<synchronous>, transform_indices = @transform_1, window_bounds = array<i64: 32, 1>}, {pipeline_mode = #tpu.pipeline_mode<synchronous>, transform_indices = @transform_2, window_bounds = array<i64: 32, 1>}, {pipeline_mode = #tpu.pipeline_mode<synchronous>, transform_indices = @transform_3, window_bounds = array<i64: 32, 32>}, {pipeline_mode = #tpu.pipeline_mode<synchronous>, transform_indices = @transform_4, window_bounds = array<i64: 3, 64, 96>}, {pipeline_mode = #tpu.pipeline_mode<synchronous>, transform_indices = @transform_5, window_bounds = array<i64: 64, 1>}, {pipeline_mode = #tpu.pipeline_mode<synchronous>, transform_indices = @transform_6, window_bounds = array<i64: 2, 256>}, {transform_indices = @transform_7, window_bounds = array<i64: 1, 64, 256>}]} {
    %cst = arith.constant 0.000000e+00 : bf16
    %0 = vector.broadcast %cst : bf16 to vector<96x16xbf16>
    %c0 = arith.constant 0 : index
    %c0_0 = arith.constant 0 : index
    %1 = vector.load %arg9[%c0, %c0_0] : memref<96x288xbf16, #tpu.memory_space<vmem>>, vector<96x16xbf16>
    tpu.vector_store %arg9[%c0, %c0_0], %0 {strides = array<i32>} : memref<96x288xbf16, #tpu.memory_space<vmem>>, vector<96x16xbf16>,
    %cst_1 = arith.constant 0.000000e+00 : bf16
    %2 = vector.broadcast %cst_1 : bf16 to vector<96x16xbf16>
    %c0_2 = arith.constant 0 : index
    %c272 = arith.constant 272 : index
    %3 = vector.load %arg9[%c0_2, %c272] : memref<96x288xbf16, #tpu.memory_space<vmem>>, vector<96x16xbf16>
    tpu.vector_store %arg9[%c0_2, %c272], %2 {strides = array<i32>} : memref<96x288xbf16, #tpu.memory_space<vmem>>, vector<96x16xbf16>,
    %c0_3 = arith.constant 0 : index
    %c0_4 = arith.constant 0 : index
    %4 = vector.load %arg7[%c0_3, %c0_4] : memref<2x256xbf16, #tpu.memory_space<vmem>>, vector<1x256xbf16>
    %c1 = arith.constant 1 : index
    %c0_5 = arith.constant 0 : index
    %5 = vector.load %arg7[%c1, %c0_5] : memref<2x256xbf16, #tpu.memory_space<vmem>>, vector<1x256xbf16>
    %c0_6 = arith.constant 0 : index
    %c0_7 = arith.constant 0 : index
    %6 = vector.load %arg2[%c0_6, %c0_7] : memref<32x1xf32, #tpu.memory_space<vmem>>, vector<32x1xf32>
    %c0_8 = arith.constant 0 : index
    %c0_9 = arith.constant 0 : index
    %7 = vector.load %arg3[%c0_8, %c0_9] : memref<32x1xf32, #tpu.memory_space<vmem>>, vector<32x1xf32>
    %c0_10 = arith.constant 0 : index
    %c0_11 = arith.constant 0 : index
    %8 = vector.load %arg6[%c0_10, %c0_11] : memref<64x1xf32, #tpu.memory_space<vmem>>, vector<64x1xf32>
    %c0_12 = arith.constant 0 : index
    %c0_13 = arith.constant 0 : index
    %c0_14 = arith.constant 0 : index
    %9 = vector.load %arg1[%c0_12, %c0_13, %c0_14] : memref<1x32x256xf32, #tpu.memory_space<vmem>>, vector<1x32x256xf32>
    %10 = vector.shape_cast %9 : vector<1x32x256xf32> to vector<32x256xf32>
    %cst_15 = arith.constant dense<0.000000e+00> : vector<32xf32>
    %11 = vector.multi_reduction <add>, %10, %cst_15 [1] : vector<32x256xf32> to vector<32xf32>
    %12 = vector.shape_cast %11 : vector<32xf32> to vector<32x1xf32>
    %c0_16 = arith.constant 0 : index
    %c0_17 = arith.constant 0 : index
    %13 = vector.load %arg4[%c0_16, %c0_17] : memref<32x32xf32, #tpu.memory_space<vmem>>, vector<32x32xf32>
    %cst_18 = arith.constant dense<0.000000e+00> : vector<32x1xf32>
    %14 = tpu.matmul %13, %12, %cst_18 {dimension_numbers = #tpu.dot_dimension_numbers<[1], [0], [0], [1], [0, 0, 1, 1], [], []>} : vector<32x32xf32>, vector<32x1xf32>, vector<32x1xf32> -> vector<32x1xf32>
    %cst_19 = arith.constant 9.765625E-4 : f32
    %15 = vector.broadcast %cst_19 : f32 to vector<32x1xf32>
    %16 = arith.mulf %14, %15 : vector<32x1xf32>
    %17 = vector.broadcast %16 : vector<32x1xf32> to vector<32x256xf32>
    %18 = arith.subf %10, %17 : vector<32x256xf32>
    %19 = arith.mulf %18, %18 : vector<32x256xf32>
    %cst_20 = arith.constant dense<0.000000e+00> : vector<32xf32>
    %20 = vector.multi_reduction <add>, %19, %cst_20 [1] : vector<32x256xf32> to vector<32xf32>
    %21 = vector.shape_cast %20 : vector<32xf32> to vector<32x1xf32>
    %c0_21 = arith.constant 0 : index
    %c0_22 = arith.constant 0 : index
    %22 = vector.load %arg4[%c0_21, %c0_22] : memref<32x32xf32, #tpu.memory_space<vmem>>, vector<32x32xf32>
    %cst_23 = arith.constant dense<0.000000e+00> : vector<32x1xf32>
    %23 = tpu.matmul %22, %21, %cst_23 {dimension_numbers = #tpu.dot_dimension_numbers<[1], [0], [0], [1], [0, 0, 1, 1], [], []>} : vector<32x32xf32>, vector<32x1xf32>, vector<32x1xf32> -> vector<32x1xf32>
    %cst_24 = arith.constant 9.765625E-4 : f32
    %24 = vector.broadcast %cst_24 : f32 to vector<32x1xf32>
    %25 = arith.mulf %23, %24 : vector<32x1xf32>
    %cst_25 = arith.constant 9.99999974E-6 : f32
    %26 = vector.broadcast %cst_25 : f32 to vector<32x1xf32>
    %27 = arith.addf %25, %26 : vector<32x1xf32>
    %28 = math.rsqrt %27 : vector<32x1xf32>
    %29 = arith.mulf %28, %6 : vector<32x1xf32>
    %30 = vector.broadcast %29 : vector<32x1xf32> to vector<32x256xf32>
    %31 = arith.mulf %18, %30 : vector<32x256xf32>
    %32 = vector.broadcast %7 : vector<32x1xf32> to vector<32x256xf32>
    %33 = arith.addf %31, %32 : vector<32x256xf32>
    %34 = arith.truncf %33 : vector<32x256xf32> to vector<32x256xbf16>
    %c32 = arith.constant 32 : index
    %c16 = arith.constant 16 : index
    %35 = vector.load %arg9[%c32, %c16] : memref<96x288xbf16, #tpu.memory_space<vmem>>, vector<32x256xbf16>
    tpu.vector_store %arg9[%c32, %c16], %34 {strides = array<i32>} : memref<96x288xbf16, #tpu.memory_space<vmem>>, vector<32x256xbf16>,
    %c32_26 = arith.constant 32 : index
    %c15 = arith.constant 15 : index
    %36 = vector.load %arg9[%c32_26, %c15] : memref<96x288xbf16, #tpu.memory_space<vmem>>, vector<32x256xbf16>
    %37 = vector.broadcast %4 : vector<1x256xbf16> to vector<32x256xbf16>
    %38 = arith.mulf %36, %37 : vector<32x256xbf16>
    %c0_27 = arith.constant 0 : index
    %c16_28 = arith.constant 16 : index
    %39 = vector.load %arg9[%c0_27, %c16_28] : memref<96x288xbf16, #tpu.memory_space<vmem>>, vector<32x256xbf16>
    tpu.vector_store %arg9[%c0_27, %c16_28], %38 {strides = array<i32>} : memref<96x288xbf16, #tpu.memory_space<vmem>>, vector<32x256xbf16>,
    %c32_29 = arith.constant 32 : index
    %c17 = arith.constant 17 : index
    %40 = vector.load %arg9[%c32_29, %c17] : memref<96x288xbf16, #tpu.memory_space<vmem>>, vector<32x256xbf16>
    %41 = vector.broadcast %5 : vector<1x256xbf16> to vector<32x256xbf16>
    %42 = arith.mulf %40, %41 : vector<32x256xbf16>
    %c64 = arith.constant 64 : index
    %c16_30 = arith.constant 16 : index
    %43 = vector.load %arg9[%c64, %c16_30] : memref<96x288xbf16, #tpu.memory_space<vmem>>, vector<32x256xbf16>
    tpu.vector_store %arg9[%c64, %c16_30], %42 {strides = array<i32>} : memref<96x288xbf16, #tpu.memory_space<vmem>>, vector<32x256xbf16>,
    %c0_31 = arith.constant 0 : index
    %c0_32 = arith.constant 0 : index
    %44 = vector.load %arg9[%c0_31, %c0_32] : memref<96x288xbf16, #tpu.memory_space<vmem>>, vector<96x256xbf16>
    %c0_33 = arith.constant 0 : index
    %c0_34 = arith.constant 0 : index
    %c0_35 = arith.constant 0 : index
    %45 = vector.load %arg5[%c0_33, %c0_34, %c0_35] : memref<3x64x96xbf16, #tpu.memory_space<vmem>>, vector<1x64x96xbf16>
    %46 = vector.shape_cast %45 : vector<1x64x96xbf16> to vector<64x96xbf16>
    %cst_36 = arith.constant dense<0.000000e+00> : vector<64x256xf32>
    %47 = tpu.matmul %46, %44, %cst_36 {dimension_numbers = #tpu.dot_dimension_numbers<[1], [0], [0], [1], [0, 0, 1, 1], [], []>} : vector<64x96xbf16>, vector<96x256xbf16>, vector<64x256xf32> -> vector<64x256xf32>
    %c0_37 = arith.constant 0 : index
    %c16_38 = arith.constant 16 : index
    %48 = vector.load %arg9[%c0_37, %c16_38] : memref<96x288xbf16, #tpu.memory_space<vmem>>, vector<96x256xbf16>
    %c1_39 = arith.constant 1 : index
    %c0_40 = arith.constant 0 : index
    %c0_41 = arith.constant 0 : index
    %49 = vector.load %arg5[%c1_39, %c0_40, %c0_41] : memref<3x64x96xbf16, #tpu.memory_space<vmem>>, vector<1x64x96xbf16>
    %50 = vector.shape_cast %49 : vector<1x64x96xbf16> to vector<64x96xbf16>
    %cst_42 = arith.constant dense<0.000000e+00> : vector<64x256xf32>
    %51 = tpu.matmul %50, %48, %cst_42 {dimension_numbers = #tpu.dot_dimension_numbers<[1], [0], [0], [1], [0, 0, 1, 1], [], []>} : vector<64x96xbf16>, vector<96x256xbf16>, vector<64x256xf32> -> vector<64x256xf32>
    %52 = arith.addf %47, %51 : vector<64x256xf32>
    %c0_43 = arith.constant 0 : index
    %c32_44 = arith.constant 32 : index
    %53 = vector.load %arg9[%c0_43, %c32_44] : memref<96x288xbf16, #tpu.memory_space<vmem>>, vector<96x256xbf16>
    %c2 = arith.constant 2 : index
    %c0_45 = arith.constant 0 : index
    %c0_46 = arith.constant 0 : index
    %54 = vector.load %arg5[%c2, %c0_45, %c0_46] : memref<3x64x96xbf16, #tpu.memory_space<vmem>>, vector<1x64x96xbf16>
    %55 = vector.shape_cast %54 : vector<1x64x96xbf16> to vector<64x96xbf16>
    %cst_47 = arith.constant dense<0.000000e+00> : vector<64x256xf32>
    %56 = tpu.matmul %55, %53, %cst_47 {dimension_numbers = #tpu.dot_dimension_numbers<[1], [0], [0], [1], [0, 0, 1, 1], [], []>} : vector<64x96xbf16>, vector<96x256xbf16>, vector<64x256xf32> -> vector<64x256xf32>
    %57 = arith.addf %52, %56 : vector<64x256xf32>
    %58 = vector.broadcast %8 : vector<64x1xf32> to vector<64x256xf32>
    %59 = arith.addf %57, %58 : vector<64x256xf32>
    %cst_48 = arith.constant 0.000000e+00 : f32
    %60 = vector.broadcast %cst_48 : f32 to vector<64x256xf32>
    %61 = arith.maximumf %59, %60 : vector<64x256xf32>
    %c0_49 = arith.constant 0 : index
    %c0_50 = arith.constant 0 : index
    %c0_51 = arith.constant 0 : index
    %62 = vector.load %arg8[%c0_49, %c0_50, %c0_51] : memref<1x64x256xf32, #tpu.memory_space<vmem>>, vector<1x64x256xf32>
    %63 = vector.shape_cast %62 : vector<1x64x256xf32> to vector<64x256xf32>
    %64 = vector.shape_cast %61 : vector<64x256xf32> to vector<1x64x256xf32>
    tpu.vector_store %arg8[%c0_49, %c0_50, %c0_51], %64 {strides = array<i32>} : memref<1x64x256xf32, #tpu.memory_space<vmem>>, vector<1x64x256xf32>,
    return
  }
  func.func @transform_0(%arg0: i32) -> (i32, i32, i32) {
    %c0_i32 = arith.constant 0 : i32
    %c0_i32_0 = arith.constant 0 : i32
    %c0_i32_1 = arith.constant 0 : i32
    return %arg0, %c0_i32, %c0_i32_0 : i32, i32, i32
  }
  func.func @transform_1(%arg0: i32) -> (i32, i32) {
    %c0_i32 = arith.constant 0 : i32
    %c0_i32_0 = arith.constant 0 : i32
    %c0_i32_1 = arith.constant 0 : i32
    return %c0_i32, %c0_i32_0 : i32, i32
  }
  func.func @transform_2(%arg0: i32) -> (i32, i32) {
    %c0_i32 = arith.constant 0 : i32
    %c0_i32_0 = arith.constant 0 : i32
    %c0_i32_1 = arith.constant 0 : i32
    return %c0_i32, %c0_i32_0 : i32, i32
  }
  func.func @transform_3(%arg0: i32) -> (i32, i32) {
    %c0_i32 = arith.constant 0 : i32
    %c0_i32_0 = arith.constant 0 : i32
    %c0_i32_1 = arith.constant 0 : i32
    return %c0_i32, %c0_i32_0 : i32, i32
  }
  func.func @transform_4(%arg0: i32) -> (i32, i32, i32) {
    %c0_i32 = arith.constant 0 : i32
    %c0_i32_0 = arith.constant 0 : i32
    %c0_i32_1 = arith.constant 0 : i32
    %c0_i32_2 = arith.constant 0 : i32
    return %c0_i32, %c0_i32_0, %c0_i32_1 : i32, i32, i32
  }
  func.func @transform_5(%arg0: i32) -> (i32, i32) {
    %c0_i32 = arith.constant 0 : i32
    %c0_i32_0 = arith.constant 0 : i32
    %c0_i32_1 = arith.constant 0 : i32
    return %c0_i32, %c0_i32_0 : i32, i32
  }
  func.func @transform_6(%arg0: i32) -> (i32, i32) {
    %c0_i32 = arith.constant 0 : i32
    %c0_i32_0 = arith.constant 0 : i32
    %c0_i32_1 = arith.constant 0 : i32
    return %c0_i32, %c0_i32_0 : i32, i32
  }
  func.func @transform_7(%arg0: i32) -> (i32, i32, i32) {
    %c0_i32 = arith.constant 0 : i32
    %c0_i32_0 = arith.constant 0 : i32
    %c0_i32_1 = arith.constant 0 : i32
    return %arg0, %c0_i32, %c0_i32_0 : i32, i32, i32
  }
}

</mosaic_0001>

<bundles_post_ra>
// kernel: tpu_custom_call.1
= control target key start
LH: loop header
LB: loop body
LE: loop exit
PB: predicated region body
PF: predicated region fallthrough
CT: control target
= control target key end

     0   :  { %12 = vsyncpa [#allocation4], 0  ;;  %s2704_s0 = inlined_call_operand.vmem [shape: f32[2,32,256], index: 0, kind: input, shape index: {}]   ;;  %s2705_s1 = inlined_call_operand.vmem [shape: f32[32,1], index: 1, kind: input, shape index: {}]   ;;  %s2706_s2 = inlined_call_operand.vmem [shape: f32[32,1], index: 2, kind: input, shape index: {}]   ;;  %s2707_s3 = inlined_call_operand.hbm [shape: f32[32,32], index: 3, kind: input, shape index: {}]   ;;  %s2708_s4 = inlined_call_operand.hbm [shape: bf16[3,64,96], index: 4, kind: input, shape index: {}]   ;;  %s2709_s5 = inlined_call_operand.vmem [shape: f32[64,1], index: 5, kind: input, shape index: {}]   ;;  %s2710_s6 = inlined_call_operand.vmem [shape: bf16[2,256], index: 6, kind: input, shape index: {}]   ;;  %s2711_s7 = inlined_call_operand.hbm [shape: f32[2,64,256], index: 7, kind: output, shape index: {}]  }
   0x1   :  { %13 = vsyncpa [#allocation7], 0 }
   0x2   :  { %14 = vsyncpa [#allocation5], 0 }
   0x3   :  { %16 = vsyncpa [#allocation5 + $0x1], 0  ;;  %s2167_s24 = smov 0   ;;  %s2169_s25 = smov 0  }
   0x4   :  { %s2171_s26 = smov 0   ;;  %s2173_s27 = smov 0  }
   0x5 LB: > { %s2188_s28 = sadd.s32 4294967295, %s2108_s27   ;;  %s1736_s29 = sadd.s32 4294967294, %s2108_s27   ;;  %s2108_s27 = sphi %s2173_s27, %s2727_s27   ;;  %s2104_s26 = sphi %s2171_s26, %s2726_s26   ;;  %s2100_s25 = sphi %s2169_s25, %s2725_s25   ;;  %s2096_s24 = sphi %s2167_s24, %s2724_s24  }
   0x6   : > { %s2192_s30 = sadd.s32 1, %s2108_s27   ;;  %s181_s8 = sadd.s32 1, %s2104_s26 }
   0x7   : > { %s178_s9 = ssub.s32 %s2108_s27, %s2192_s30  ;;  %p191_p0 = scmp.ne.s32.totalorder %s2104_s26, %s2100_s25 }
   0x8   : > { %p179_p1 = scmp.eq.s32.totalorder %s178_s9, 0  ;;  %p192_p2 = scmp.eq.s32.totalorder %s2188_s28, 1 }
   0x9   : > { %p197_p3 = scmp.ne.s32.totalorder %s2100_s25, %s2096_s24  ;;  %p198_p4 = scmp.eq.s32.totalorder %s1736_s29, 1 }
   0xa   : > { %s2203_s10 = scalar_select %p179_p1, %s2104_s26, %s181_s8  }
   0xb   : > { %p2205_p5 = por %p192_p2, %p191_p0  ;;  %p2209_p6 = por %p198_p4, %p197_p3 }
   0xc   : > { %p1737_p7 = scmp.ge.s32.totalorder %s2108_s27, 1  ;;  %p205_p8 = scmp.lt.s32.totalorder %s2108_s27, 3 }
   0xd   : > { %s2714_s12 = scalar_select %p2209_p6, 1, 0 }
   0xe   : > { %p2712_p9 = scmp.eq.s32.totalorder %s2188_s28, 0  ;;  %p2216_p10 = pnand %p1737_p7, %p205_p8 }
   0xf   : > { %s2110_s14 = smov [#allocation3]   ;;  %s2111_s17 = smov [#allocation6]  }
  0x10   : > { %s223_s15 = sshll.u32 %s2110_s14, 4  ;;  %p1881_p11 = pneg %p2216_p10  ;;  %s224_s15 = int_to_ptr.vmem [resolvable:$true] %s223_s15 }
  0x11   : > { %s236_s18 = sshll.u32 %s2111_s17, 4  ;;  %s1999_s19 = scalar_lea.vmem %s224_s15, 512  ;;  %s237_s18 = int_to_ptr.vmem [resolvable:$true] %s236_s18 }
  0x12   : > { %p2224_p12 = pnand %p2712_p9, %p1881_p11  ;;  %p2000_p0 = scmp.ne.s32.totalorder %s224_s15, %s1999_s19 }
  0x13   : > { %p2007_p3 = scmp.lt.s32.totalorder %s224_s15, %s224_s15  ;;  %p2008_p4 = scmp.lt.s32.totalorder %s1999_s19, %s1999_s19 }
  0x14   : > { %p1990_p13 = pneg %p2224_p12 }
  0x15   : > { %p2009_p7 = por %p2008_p4, %p2007_p3 }
  0x16   : > { %p2002_p1 = pnand %p2000_p0, %p1990_p13 }
  0x18   : > { %p2003_p2 = pneg %p2002_p1 }
  0x1a   : > { %p2010_p8 = pnand %p2009_p7, %p2003_p2 }
  0x1c   : > { %2013 = shalt.err (!%p2010_p8)
}
  0x1d   : > { %s2112_s20 = smov 128   ;;  %s2113_s21 = smov 8  }
  0x1e   : > { %1884 = dma.hbm_to_vmem [thread:$0]  (!%p2224_p12), %s2707_s3, 512, %s224_s15, [#allocation4], %s2112_s20, %s2112_s20, %s2113_s21  }
  0x1f   : > { %s2025_s29 = scalar_lea.vmem %s237_s18, 1536  ;;  %p2033_p9 = scmp.lt.s32.totalorder %s237_s18, %s237_s18 }
  0x20   : > { %p2026_p11 = scmp.ne.s32.totalorder %s237_s18, %s2025_s29  ;;  %p2034_p6 = scmp.lt.s32.totalorder %s2025_s29, %s2025_s29 }
  0x22   : > { %p2028_p0 = pnand %p2026_p11, %p1990_p13  ;;  %p2035_p3 = por %p2034_p6, %p2033_p9 }
  0x24   : > { %p2029_p1 = pneg %p2028_p0 }
  0x26   : > { %p2036_p2 = pnand %p2035_p3, %p2029_p1 }
  0x28   : > { %2039 = shalt.err (!%p2036_p2)
}
  0x29   : > { %s2114_s8 = smov 64   ;;  %s2115_s9 = smov 4  }
  0x2a   : > { %1887 = dma.hbm_to_vmem [thread:$0]  (!%p2224_p12), %s2708_s4, 1536, %s237_s18, [#allocation7], %s2114_s8, %s2114_s8, %s2115_s9  }
  0x2b   : > { %266 = sbr.rel (%p2216_p10) target bundleno = 1710 (0x6ae), region = 48  ;;  %p2717_p4 = scmp.eq.s32.totalorder (!%p2216_p10), %s2188_s28, 0 }
  0x30   : > { %2083 = dma.done.wait (%p2717_p4), [#allocation4], 512   ;;  %p2718_p13 = pmov %p2717_p4 }
  0x31   : > { %p2719_p6 = pmov %p2717_p4 }
  0x32   : > { %2085 = vsyncadd (%p2718_p13), [#allocation4], 4294966784 }
  0x33   : > { %2087 = dma.done.wait (%p2719_p6), [#allocation7], 1536   ;;  %p2720_p9 = pmov %p2717_p4 }
  0x34   : > { %p302_p7 = scmp.lt.s32.totalorder %s2188_s28, 1  ;;  %v371_v12 = vld [vmem:[#allocation3] sm:$0xff]  ;;  %vm375_vm0 = vcmask 261120   ;;  %v2269_v17 = vld [vmem:[#allocation3 + $0x8] sm:$0xff]  ;;  %v2271_v18 = vld [vmem:[#allocation3 + $0x10] sm:$0xff]  ;;  %v2116_v20 = vmov 0  }
  0x35   : > { %2089 = vsyncadd (%p2720_p9), [#allocation7], 4294965760  ;;  %1839 = vmatprep.mubr.msk.f32.mxu0 %vm375_vm0, %v371_v12  ;;  %1853 = vmatprep.mubr.msk.f32.mxu1 %vm375_vm0, %v371_v12  ;;  %v2277_v19 = vld [vmem:[#allocation3 + $0x18] sm:$0xff]  ;;  %v341_v53 = vld [vmem:[%s2706_s2 + $0x10] sm:$0xff]  ;;  %vm308_vm1 = vcmask 125952   ;;  %vm321_vm2 = vcmask 257152  }
  0x36   : > { %s303_s15 = scalar_select %p302_p7, %s2188_s28, 1  ;;  %1946 = vset.pattern.permute.xlu1 %v2116_v20  ;;  %1945 = vset.pattern.permute.xlu0 %v2116_v20  ;;  %v342_v54 = vld [vmem:[%s2706_s2 + $0x18] sm:$0xff]  ;;  %316 = vst.msk [vmem:[#allocation2 + $0x54] sm:$0xf] %vm308_vm1, %v2116_v20  ;;  %309 = vst.msk [vmem:[#allocation2] sm:$0xf] %vm308_vm1, %v2116_v20 }
  0x37   : > { %329 = vst.msk [vmem:[#allocation2 + $0x5c] sm:$0xf] %vm321_vm2, %v2116_v20  ;;  %322 = vst.msk [vmem:[#allocation2 + $0x8] sm:$0xf] %vm321_vm2, %v2116_v20  ;;  %s2118_s29 = smov 16   ;;  %s2119_s8 = smov 15  }
  0x38   : > { %s1809_s16 = sshll.u32 %s303_s15, 6  ;;  %310 = vst.msk [vmem:[#allocation2 + $0xc] sm:$0xf] %vm308_vm1, %v2116_v20  ;;  %311 = vst.msk [vmem:[#allocation2 + $0x18] sm:$0xf] %vm308_vm1, %v2116_v20  ;;  %s2120_s9 = smov 17  }
  0x39   : > { %s306_s19 = scalar_lea.vmem %s2704_s0, %s1809_s16  ;;  %312 = vst.msk [vmem:[#allocation2 + $0x24] sm:$0xf] %vm308_vm1, %v2116_v20  ;;  %313 = vst.msk [vmem:[#allocation2 + $0x30] sm:$0xf] %vm308_vm1, %v2116_v20  ;;  %vm727_vm3 = vcmask 1043584   ;;  %vm728_vm4 = vcmask 1047556  }
  0x3a   : > { %v357_v0 = vld [vmem:[%s306_s19 + $0x30] sm:$0xff]  ;;  %v358_v1 = vld [vmem:[%s306_s19 + $0x38] sm:$0xff]  ;;  %v355_v2 = vld [vmem:[%s306_s19 + $0x20] sm:$0xff]  ;;  %314 = vst.msk [vmem:[#allocation2 + $0x3c] sm:$0xf] %vm308_vm1, %v2116_v20  ;;  %vm714_vm5 = vcmask 130048  }
  0x3b   : > { %v368_v3 = vadd.f32 %v358_v1, %v357_v0  ;;  %v356_v4 = vld [vmem:[%s306_s19 + $0x28] sm:$0xff]  ;;  %v353_v5 = vld [vmem:[%s306_s19 + $0x10] sm:$0xff]  ;;  %v354_v6 = vld [vmem:[%s306_s19 + $0x18] sm:$0xff]  ;;  %315 = vst.msk [vmem:[#allocation2 + $0x48] sm:$0xf] %vm308_vm1, %v2116_v20  ;;  %vm886_vm7 = vcmask 138240  }
  0x3c   : > { %v362_v7 = vadd.f32 %v354_v6, %v353_v5  ;;  %v2261_v8 = vld [vmem:[%s306_s19] sm:$0xff]  ;;  %v2263_v9 = vld [vmem:[%s306_s19 + $0x8] sm:$0xff]  ;;  %v365_v10 = vadd.f32 %v356_v4, %v355_v2  ;;  %317 = vst.msk [vmem:[#allocation2 + $0x60] sm:$0xf] %vm308_vm1, %v2116_v20  ;;  %318 = vst.msk [vmem:[#allocation2 + $0x6c] sm:$0xf] %vm308_vm1, %v2116_v20 }
  0x3d   : > { %369 = vadd.xlane.f32.xlu0 %v368_v3  ;;  %v359_v11 = vadd.f32 %v2263_v9, %v2261_v8  ;;  %319 = vst.msk [vmem:[#allocation2 + $0x78] sm:$0xf] %vm308_vm1, %v2116_v20  ;;  %320 = vst.msk [vmem:[#allocation2 + $0x84] sm:$0xf] %vm308_vm1, %v2116_v20  ;;  %s2121_s14 = smov 127   ;;  %vm791_vm8 = vcmask 121856  }
  0x3e   : > { %363 = vadd.xlane.f32.xlu1 %v362_v7  ;;  %v338_v7 = vld [vmem:[%s2705_s1 + $0x18] sm:$0xff]  ;;  %323 = vst.msk [vmem:[#allocation2 + $0x14] sm:$0xf] %vm321_vm2, %v2116_v20  ;;  %324 = vst.msk [vmem:[#allocation2 + $0x20] sm:$0xf] %vm321_vm2, %v2116_v20  ;;  %s2122_s17 = smov 1  }
  0x3f   : > { %325 = vst.msk [vmem:[#allocation2 + $0x2c] sm:$0xf] %vm321_vm2, %v2116_v20  ;;  %326 = vst.msk [vmem:[#allocation2 + $0x38] sm:$0xf] %vm321_vm2, %v2116_v20  ;;  %s2123_s15 = smov 112   ;;  %vm930_vm9 = vcmask 1043456  }
  0x40   : > { %327 = vst.msk [vmem:[#allocation2 + $0x44] sm:$0xf] %vm321_vm2, %v2116_v20  ;;  %328 = vst.msk [vmem:[#allocation2 + $0x50] sm:$0xf] %vm321_vm2, %v2116_v20  ;;  %vm932_vm10 = vcmask 1039360   ;;  %vm831_vm11 = vcmask 7168  }
  0x41   : > { %366 = vadd.xlane.f32.xlu0 %v365_v10  ;;  %330 = vst.msk [vmem:[#allocation2 + $0x68] sm:$0xf] %vm321_vm2, %v2116_v20  ;;  %331 = vst.msk [vmem:[#allocation2 + $0x74] sm:$0xf] %vm321_vm2, %v2116_v20  ;;  %vm1156_vm12 = vcmask 785408   ;;  %s2124_s16 = smov 96  }
  0x42   : > { %360 = vadd.xlane.f32.xlu1 %v359_v11  ;;  %332 = vst.msk [vmem:[#allocation2 + $0x80] sm:$0xf] %vm321_vm2, %v2116_v20  ;;  %333 = vst.msk [vmem:[#allocation2 + $0x8c] sm:$0xf] %vm321_vm2, %v2116_v20  ;;  %vm1131_vm13 = vcmask 916480   ;;  %s299_s20 = sand.u32 1, %s2100_s25  }
  0x43   : > { %vm2412_vm6 = vmor %vm728_vm4, %vm727_vm3  ;;  %s1744_s21 = sshll.u32 %s299_s20, 7  ;;  %s1814_s23 = sshll.u32 %s2188_s28, 11 }
  0x44   : > { %s2623_s22 = scalar_lea.vmem [#allocation8], %s1744_s21  ;;  %s2663_s28 = scalar_lea.sflag [#allocation5], %s299_s20 }
  0xc6   : > { %v370_v13 = vpop.xlane.xlu0 %369 }
  0xc7   : > { %1831 = vmatprep.subr.mxu0 %v370_v13  ;;  %v364_v14 = vpop.xlane.xlu1 %363 }
  0xc8   : > { %1832 = vmatpush3.msra.mxu0 %v370_v13  ;;  %v336_v13 = vld [vmem:[%s2705_s1 + $0x8] sm:$0xff] }
  0xca   : > { %v367_v15 = vpop.xlane.xlu0 %366 }
  0xcb   : > { %1833 = vmatprep.subr.mxu0 %v367_v15  ;;  %v361_v16 = vpop.xlane.xlu1 %360 }
  0xcc   : > { %1834 = vmatpush3.msra.mxu0 %v367_v15 }
  0xcd   : > { %1835 = vmatprep.subr.mxu0 %v364_v14 }
  0xce   : > { %1836 = vmatpush3.msra.mxu0 %v364_v14 }
  0xcf   : > { %1837 = vmatprep.subr.mxu0 %v361_v16 }
  0xd0   : > { %1838 = vmatpush3.msra.mxu0 %v361_v16  ;;  %v335_v16 = vld [vmem:[%s2705_s1] sm:$0xff] }
  0xd1   : > { %1840 = vmatmul.mubr.msk.f32.vlgmr.msra.gmra.mxu0 %vm375_vm0, %v2269_v17 }
  0xd2   : > { %1842 = vmatprep.mubr.msk.f32.mxu0 %vm375_vm0, %v2271_v18 }
  0xd5   : > { %1843 = vmatmul.mubr.msk.f32.gmra.mxu0 %vm375_vm0, %v2277_v19 }
  0xd6   : > { %1201 = vmatprep.mubr.bf16.mxu0 %v2116_v20 }
 0x191   : > { %v1841_v21 = vpop.f32.mrf.mxu0 }
 0x192   : > { %v474_v22 = vmul.f32 0.0009765625, %v1841_v21  ;;  %v339_v21 = vld [vmem:[%s2706_s2] sm:$0xff] }
 0x193   : > { %v454_v23 = vpop.f32.mrf.mxu0 }
 0x194   : > { %484 = vperm.xlu1 %1946, %v474_v22   ;;  %v473_v28 = vmul.f32 0.0009765625, %v454_v23  ;;  %v2117_v22 = vmov 1966171168  }
 0x195   : > { %v1844_v24 = vpop.f32.mrf.mxu0  ;;  %v756_v23 = vunpack.c.l.s4 %v2117_v22 }
 0x196   : > { %v476_v25 = vmul.f32 0.0009765625, %v1844_v24  ;;  %v758_v24 = vlaneseq }
 0x197   : > { %v464_v26 = vpop.f32.mrf.mxu0 }
 0x198   : > { %v475_v27 = vmul.f32 0.0009765625, %v464_v26  ;;  %494 = vperm.xlu0 %1945, %v476_v25   ;;  %v757_v25 = vunpack.c.0.s8 %v756_v23  ;;  %v759_v26 = vshrl.u32 %v758_v24, 7 }
 0x19a   : > { %489 = vperm.xlu1 %1946, %v475_v27   ;;  %v1759_v27 = vld.sshfl [vmem:[%s2710_s6] sm:$0x11 pattern:$0x75316420] }
 0x19e   : > { %479 = vperm.xlu1 %1946, %v473_v28  }
 0x20f   : > { %v485_v29 = vpop.permute.xlu1 %484 }
 0x210   : > { %v2284_v30 = vsub.f32 %v353_v5, %v485_v29  ;;  %v2286_v32 = vsub.f32 %v354_v6, %v485_v29  ;;  %v754_v29 = vcombine.high %v1759_v27, %v1759_v27 }
 0x212   : > { %v507_v40 = vmul.f32 %v2284_v30, %v2284_v30  ;;  %v508_v44 = vmul.f32 %v2286_v32, %v2286_v32 }
 0x213   : > { %v495_v31 = vpop.permute.xlu0 %494 }
 0x214   : > { %v2288_v33 = vsub.f32 %v357_v0, %v495_v31  ;;  %v2290_v34 = vsub.f32 %v358_v1, %v495_v31  ;;  %v516_v49 = vadd.f32 %v508_v44, %v507_v40  ;;  %v760_v31 = vsub.s32 %v757_v25, %v759_v26 }
 0x215   : > { %v490_v35 = vpop.permute.xlu1 %489 }
 0x216   : > { %v2292_v36 = vsub.f32 %v355_v2, %v490_v35  ;;  %v2294_v37 = vsub.f32 %v356_v4, %v490_v35  ;;  %v511_v38 = vmul.f32 %v2288_v33, %v2288_v33  ;;  %v512_v39 = vmul.f32 %v2290_v34, %v2290_v34 }
 0x218   : > { %v522_v41 = vadd.f32 %v512_v39, %v511_v38  ;;  %v509_v42 = vmul.f32 %v2292_v36, %v2292_v36  ;;  %v510_v43 = vmul.f32 %v2294_v37, %v2294_v37  ;;  %v761_v38 = vrot.slane %v1759_v27, %v760_v31 }
 0x219   : > { %v480_v45 = vpop.permute.xlu1 %479  ;;  %v768_v39 = vrot.slane %v754_v29, %v760_v31 }
 0x21a   : > { %v2309_v46 = vsub.f32 %v2261_v8, %v480_v45  ;;  %v2312_v47 = vsub.f32 %v2263_v9, %v480_v45  ;;  %523 = vadd.xlane.f32.xlu1 %v522_v41  ;;  %v519_v48 = vadd.f32 %v510_v43, %v509_v42  ;;  %v337_v9 = vld [vmem:[%s2705_s1 + $0x10] sm:$0xff]  ;;  %v864_v44 = vshrl.u32 %v761_v38, 16 }
 0x21b   : > { %v871_v45 = vshrl.u32 %v768_v39, 16 }
 0x21c   : > { %520 = vadd.xlane.f32.xlu0 %v519_v48  ;;  %v505_v50 = vmul.f32 %v2309_v46, %v2309_v46  ;;  %v506_v51 = vmul.f32 %v2312_v47, %v2312_v47 }
 0x21e   : > { %517 = vadd.xlane.f32.xlu1 %v516_v49  ;;  %v513_v52 = vadd.f32 %v506_v51, %v505_v50 }
 0x222   : > { %514 = vadd.xlane.f32.xlu1 %v513_v52 }
 0x233   : > { %666 = vperm.xlu1 %1946, %v341_v53   ;;  %v770_v53 = vpack.i.b16 %v761_v38, %v761_v38 }
 0x237   : > { %671 = vperm.xlu1 %1946, %v342_v54   ;;  %v774_v54 = vsub.s32 0, %v759_v26 }
 0x2a3   : > { %v524_v55 = vpop.xlane.xlu1 %523 }
 0x2a4   : > { %1845 = vmatprep.subr.mxu1 %v524_v55 }
 0x2a5   : > { %v521_v56 = vpop.xlane.xlu0 %520  ;;  %1846 = vmatpush3.msra.mxu1 %v524_v55  ;;  %v777_v55 = vpack.i.b16 %v768_v39, %v768_v39 }
 0x2a6   : > { %1847 = vmatprep.subr.mxu1 %v521_v56 }
 0x2a7   : > { %1848 = vmatpush3.msra.mxu1 %v521_v56  ;;  %v518_v57 = vpop.xlane.xlu1 %517 }
 0x2a8   : > { %1849 = vmatprep.subr.mxu1 %v518_v57 }
 0x2a9   : > { %1850 = vmatpush3.msra.mxu1 %v518_v57 }
 0x2ab   : > { %v515_v58 = vpop.xlane.xlu1 %514 }
 0x2ac   : > { %1851 = vmatprep.subr.mxu1 %v515_v58 }
 0x2ad   : > { %1852 = vmatpush3.msra.mxu1 %v515_v58 }
 0x2ae   : > { %1854 = vmatmul.mubr.msk.f32.vlgmr.msra.gmra.mxu1 %vm375_vm0, %v2269_v17 }
 0x2af   : > { %1856 = vmatprep.mubr.msk.f32.mxu1 %vm375_vm0, %v2271_v18  ;;  %v667_v28 = vpop.permute.xlu1 %666 }
 0x2b2   : > { %1857 = vmatmul.mubr.msk.f32.gmra.mxu1 %vm375_vm0, %v2277_v19  ;;  %v340_v19 = vld [vmem:[%s2706_s2 + $0x8] sm:$0xff] }
 0x2b3   : > { %1318 = vmatprep.mubr.bf16.mxu1 %v2116_v20  ;;  %v672_v35 = vpop.permute.xlu1 %671 }
 0x36e   : > { %v1855_v59 = vpop.f32.mrf.mxu1 }
 0x36f   : > { %v611_v60 = vmul.f32 0.0009765625, %v1855_v59 }
 0x370   : > { %v591_v61 = vpop.f32.mrf.mxu1 }
 0x371   : > { %v610_v63 = vmul.f32 0.0009765625, %v591_v61  ;;  %v615_v1 = vadd.f32 1e-05, %v611_v60 }
 0x372   : > { %v1858_v62 = vpop.f32.mrf.mxu1 }
 0x373   : > { %v613_v0 = vmul.f32 0.0009765625, %v1858_v62  ;;  %v614_v5 = vadd.f32 1e-05, %v610_v63  ;;  %v872_v62 = vpack.i.b16 %v871_v45, %v871_v45  ;;  %v782_v63 = vrot.slane %v777_v55, %v774_v54 }
 0x374   : > { %v601_v2 = vpop.f32.mrf.mxu1 }
 0x375   : > { %v617_v3 = vadd.f32 1e-05, %v613_v0  ;;  %v612_v4 = vmul.f32 0.0009765625, %v601_v2 }
 0x377   : > { %1980 = vrsqrt.f32 %v617_v3  ;;  %v616_v6 = vadd.f32 1e-05, %v612_v4 }
 0x378   : > { %1982 = vrsqrt.f32 %v615_v1 }
 0x379   : > { %1984 = vrsqrt.f32 %v616_v6 }
 0x37a   : > { %1986 = vrsqrt.f32 %v614_v5 }
 0x384   : > { %v1981_v8 = vpop.eup %1980 }
 0x385   : > { %v1983_v10 = vpop.eup %1982  ;;  %v625_v11 = vmul.f32 %v1981_v8, %v338_v7  ;;  %v877_v7 = vrot.slane %v872_v62, %v774_v54 }
 0x386   : > { %v1985_v12 = vpop.eup %1984  ;;  %v623_v17 = vmul.f32 %v1983_v10, %v336_v13 }
 0x387   : > { %643 = vperm.xlu0 %1945, %v625_v11   ;;  %v624_v14 = vmul.f32 %v1985_v12, %v337_v9  ;;  %v1987_v15 = vpop.eup %1986 }
 0x388   : > { %v622_v18 = vmul.f32 %v1987_v15, %v335_v16 }
 0x389   : > { %638 = vperm.xlu1 %1946, %v624_v14  }
 0x38b   : > { %633 = vperm.xlu0 %1945, %v623_v17  }
 0x38d   : > { %628 = vperm.xlu1 %1946, %v622_v18  }
 0x38f   : > { %661 = vperm.xlu0 %1945, %v340_v19  }
 0x391   : > { %656 = vperm.xlu1 %1946, %v339_v21  }
 0x402   : > { %v644_v40 = vpop.permute.xlu0 %643 }
 0x403   : > { %v652_v41 = vmul.f32 %v644_v40, %v2288_v33  ;;  %v653_v42 = vmul.f32 %v644_v40, %v2290_v34  ;;  %v865_v33 = vpack.i.b16 %v864_v44, %v864_v44 }
 0x404   : > { %v639_v43 = vpop.permute.xlu1 %638 }
 0x405   : > { %v680_v48 = vadd.f32 %v672_v35, %v652_v41  ;;  %v681_v49 = vadd.f32 %v672_v35, %v653_v42  ;;  %v650_v50 = vmul.f32 %v639_v43, %v2292_v36  ;;  %v651_v51 = vmul.f32 %v639_v43, %v2294_v37 }
 0x406   : > { %v634_v52 = vpop.permute.xlu0 %633  ;;  %v775_v37 = vrot.slane %v770_v53, %v774_v54 }
 0x407   : > { %v678_v56 = vadd.f32 %v667_v28, %v650_v50  ;;  %v679_v57 = vadd.f32 %v667_v28, %v651_v51  ;;  %v1813_v59 = vpack.c.bf16 %v681_v49, %v680_v48  ;;  %v648_v34 = vmul.f32 %v634_v52, %v2284_v30 }
 0x408   : > { %v629_v58 = vpop.permute.xlu1 %628  ;;  %v649_v60 = vmul.f32 %v634_v52, %v2286_v32  ;;  %v870_v30 = vrot.slane %v865_v33, %v774_v54  ;;  %v1760_v9 = vcombine.low %v775_v37, %v782_v63 }
 0x409   : > { %v1812_v61 = vpack.c.bf16 %v679_v57, %v678_v56  ;;  %708 = vrot.lane.b32.xlu0 %v1813_v59, %s2118_s29  ;;  %v646_v0 = vmul.f32 %v629_v58, %v2309_v46  ;;  %v647_v1 = vmul.f32 %v629_v58, %v2312_v47 }
 0x40a   : > { %v662_v36 = vpop.permute.xlu0 %661  ;;  %v1761_v10 = vcombine.low %v870_v30, %v877_v7 }
 0x40b   : > { %v676_v2 = vadd.f32 %v662_v36, %v648_v34  ;;  %v677_v3 = vadd.f32 %v662_v36, %v649_v60  ;;  %706 = vrot.lane.b32.xlu1 %v1812_v61, %s2118_s29 }
 0x40c   : > { %v657_v4 = vpop.permute.xlu1 %656 }
 0x40d   : > { %v1811_v5 = vpack.c.bf16 %v677_v3, %v676_v2  ;;  %v674_v32 = vadd.f32 %v657_v4, %v646_v0  ;;  %v675_v6 = vadd.f32 %v657_v4, %v647_v1 }
 0x40f   : > { %v1810_v8 = vpack.c.bf16 %v675_v6, %v674_v32  ;;  %704 = vrot.lane.b32.xlu0 %v1811_v5, %s2118_s29 }
 0x411   : > { %702 = vrot.lane.b32.xlu1 %v1810_v8, %s2118_s29 }
 0x413   : > { %788 = vrot.lane.b32.xlu0 %v1760_v9, %s2119_s8  ;;  %s1652_s8 = sshll.u32 %s2623_s22, 4  ;;  %s2657_s8 = int_to_ptr.vmem [resolvable:$true] %s1652_s8 }
 0x415   : > { %883 = vrot.lane.b32.xlu1 %v1761_v10, %s2120_s9 }
 0x47b   : > { %v709_v46 = vpop.permute.xlu0 %708 }
 0x47c   : > { %v713_v11 = vrot.slane %v709_v46, 4 }
 0x47d   : > { %v707_v12 = vpop.permute.xlu1 %706 }
 0x47e   : > { %v712_v13 = vrot.slane %v707_v12, 4  ;;  %v718_v14 = vsel %vm714_vm5, %v713_v11, %v709_v46  ;;  %737 = vst.msk [vmem:[#allocation2 + $0x5c] sm:$0xf] %vm308_vm1, %v713_v11 }
 0x47f   : > { %736 = vst.msk [vmem:[#allocation2 + $0x54] sm:$0xff] %vm2412_vm6, %v718_v14 }
 0x480   : > { %v717_v15 = vsel %vm714_vm5, %v712_v13, %v707_v12  ;;  %735 = vst.msk [vmem:[#allocation2 + $0x50] sm:$0xf] %vm308_vm1, %v712_v13 }
 0x481   : > { %734 = vst.msk [vmem:[#allocation2 + $0x48] sm:$0xff] %vm2412_vm6, %v717_v15  ;;  %v705_v16 = vpop.permute.xlu0 %704 }
 0x482   : > { %v711_v17 = vrot.slane %v705_v16, 4 }
 0x483   : > { %v703_v18 = vpop.permute.xlu1 %702 }
 0x484   : > { %v716_v19 = vsel %vm714_vm5, %v711_v17, %v705_v16  ;;  %733 = vst.msk [vmem:[#allocation2 + $0x44] sm:$0xf] %vm308_vm1, %v711_v17  ;;  %v710_v21 = vrot.slane %v703_v18, 4 }
 0x485   : > { %732 = vst.msk [vmem:[#allocation2 + $0x3c] sm:$0xff] %vm2412_vm6, %v716_v19  ;;  %v863_v38 = vld [vmem:[#allocation2 + $0x5c] sm:$0xf]  ;;  %v789_v42 = vpop.permute.xlu0 %788 }
 0x486   : > { %v715_v22 = vsel %vm714_vm5, %v710_v21, %v703_v18  ;;  %731 = vst.msk [vmem:[#allocation2 + $0x38] sm:$0xf] %vm308_vm1, %v710_v21  ;;  %v862_v40 = vld [vmem:[#allocation2 + $0x54] sm:$0xff]  ;;  %v790_v48 = vrot.slane %v789_v42, 4  ;;  %v745_v57 = vld [vmem:[#allocation2 + $0x5c] sm:$0xf] }
 0x487   : > { %730 = vst.msk [vmem:[#allocation2 + $0x30] sm:$0xff] %vm2412_vm6, %v715_v22  ;;  %v884_v23 = vpop.permute.xlu1 %883  ;;  %v861_v43 = vld [vmem:[#allocation2 + $0x50] sm:$0xf] }
 0x488   : > { %v885_v24 = vrot.slane %v884_v23, 4  ;;  %v860_v45 = vld [vmem:[#allocation2 + $0x48] sm:$0xff]  ;;  %v792_v52 = vsel %vm791_vm8, %v790_v48, %v789_v42  ;;  %v743_v54 = vld [vmem:[#allocation2 + $0x50] sm:$0xf]  ;;  %v802_v58 = vmul.bf16 %v790_v48, %v745_v57 }
 0x489   : > { %v801_v55 = vmul.bf16 %v862_v40, %v792_v52  ;;  %v800_v56 = vmul.bf16 %v790_v48, %v743_v54  ;;  %v799_v59 = vmul.bf16 %v860_v45, %v792_v52  ;;  %v2434_v37 = vld [vmem:[#allocation2 + $0x50] ss:$12 sps:$4 sm:$0xff]   ;;  %v2436_v63 = vcombine.high %v860_v45, %v862_v40 }
 0x48a   : > { %v887_v26 = vsel %vm886_vm7, %v885_v24, %v884_v23  ;;  %v897_v39 = vmul.bf16 %v885_v24, %v863_v38  ;;  %v895_v44 = vmul.bf16 %v885_v24, %v861_v43  ;;  %v2444_v1 = vcombine.low %v860_v45, %v862_v40 }
 0x48b   : > { %v896_v41 = vmul.bf16 %v887_v26, %v862_v40  ;;  %v894_v49 = vmul.bf16 %v887_v26, %v860_v45  ;;  %v859_v50 = vld [vmem:[#allocation2 + $0x44] sm:$0xf] }
 0x48c   : > { %v858_v29 = vld [vmem:[#allocation2 + $0x3c] sm:$0xff]  ;;  %v893_v51 = vmul.bf16 %v885_v24, %v859_v50  ;;  %v741_v60 = vld [vmem:[#allocation2 + $0x44] sm:$0xf] }
 0x48d   : > { %v857_v25 = vld [vmem:[#allocation2 + $0x38] sm:$0xf]  ;;  %v892_v53 = vmul.bf16 %v887_v26, %v858_v29  ;;  %v797_v33 = vmul.bf16 %v858_v29, %v792_v52  ;;  %v798_v62 = vmul.bf16 %v790_v48, %v741_v60 }
 0x48e   : > { %v891_v27 = vmul.bf16 %v885_v24, %v857_v25  ;;  %v856_v28 = vld [vmem:[#allocation2 + $0x30] sm:$0xff]  ;;  %v739_v61 = vld [vmem:[#allocation2 + $0x38] sm:$0xf] }
 0x48f   : > { %v890_v31 = vmul.bf16 %v887_v26, %v856_v28  ;;  %v2432_v35 = vcombine.low %v856_v28, %v858_v29  ;;  %v795_v34 = vmul.bf16 %v856_v28, %v792_v52  ;;  %v796_v36 = vmul.bf16 %v790_v48, %v739_v61  ;;  %v1959_v47 = vld [vmem:[#allocation2 + $0x38] ss:$12 sps:$4 sm:$0xff]  }
 0x490   : > { %908 = vrot.lane.b32.xlu0 %v891_v27, %s2121_s14  ;;  %v2442_v0 = vcombine.high %v856_v28, %v858_v29 }
 0x491   : > { %906 = vrot.lane.b32.xlu1 %v890_v31, %s2121_s14 }
 0x494   : > { %920 = vrot.lane.b32.xlu0 %v897_v39, %s2121_s14 }
 0x495   : > { %918 = vrot.lane.b32.xlu1 %v896_v41, %s2121_s14 }
 0x498   : > { %916 = vrot.lane.b32.xlu0 %v895_v44, %s2121_s14 }
 0x499   : > { %914 = vrot.lane.b32.xlu1 %v894_v49, %s2121_s14 }
 0x49c   : > { %912 = vrot.lane.b32.xlu0 %v893_v51, %s2121_s14 }
 0x49d   : > { %910 = vrot.lane.b32.xlu1 %v892_v53, %s2121_s14 }
 0x4a0   : > { %823 = vrot.lane.b32.xlu0 %v801_v55, %s2122_s17 }
 0x4a1   : > { %821 = vrot.lane.b32.xlu1 %v800_v56, %s2122_s17 }
 0x4a4   : > { %825 = vrot.lane.b32.xlu0 %v802_v58, %s2122_s17 }
 0x4a5   : > { %819 = vrot.lane.b32.xlu1 %v799_v59, %s2122_s17 }
 0x4a8   : > { %815 = vrot.lane.b32.xlu0 %v797_v33, %s2122_s17 }
 0x4a9   : > { %811 = vrot.lane.b32.xlu1 %v795_v34, %s2122_s17 }
 0x4ac   : > { %817 = vrot.lane.b32.xlu0 %v798_v62, %s2122_s17  ;;  %v1969_v62 = vld [vmem:[#allocation6] sm:$0xff]  }
 0x4ad   : > { %813 = vrot.lane.b32.xlu1 %v796_v36, %s2122_s17  ;;  %s2653_s17 = scalar_lea.hbm %s2711_s7, %s1814_s23 }
 0x4b0   : > { %1117 = vrot.lane.b32.xlu0 %v2434_v37, %s2123_s15 }
 0x4b1   : > { %1115 = vrot.lane.b32.xlu1 %v2436_v63, %s2123_s15 }
 0x4b4   : > { %1109 = vrot.lane.b32.xlu0 %v2442_v0, %s2123_s15 }
 0x4b5   : > { %1113 = vrot.lane.b32.xlu1 %v2444_v1, %s2123_s15 }
 0x502   : > { %v909_v2 = vpop.permute.xlu0 %908 }
 0x503   : > { %v923_v3 = vrot.slane %v909_v2, 4  ;;  %949 = vst.msk [vmem:[#allocation2 + $0x68] sm:$0xf] %vm308_vm1, %v909_v2  ;;  %v907_v4 = vpop.permute.xlu1 %906  ;;  %v1971_v2 = vld [vmem:[#allocation6 + $0x8] sm:$0xff]  }
 0x504   : > { %v922_v30 = vrot.slane %v907_v4, 4 }
 0x506   : > { %v931_v5 = vsel %vm930_vm9, %v922_v30, %v923_v3  ;;  %v921_v32 = vpop.permute.xlu0 %920  ;;  %v1973_v3 = vld [vmem:[#allocation6 + $0x10] sm:$0xff]   ;;  %v348_v30 = vld [vmem:[%s2709_s5 + $0x28] sm:$0xff] }
 0x507   : > { %v933_v6 = vsel %vm932_vm10, %v907_v4, %v931_v5  ;;  %v929_v7 = vrot.slane %v921_v32, 4  ;;  %955 = vst.msk [vmem:[#allocation2 + $0x8c] sm:$0xf] %vm308_vm1, %v921_v32  ;;  %v919_v8 = vpop.permute.xlu1 %918  ;;  %v347_v4 = vld [vmem:[%s2709_s5 + $0x20] sm:$0xff]  ;;  %v349_v5 = vld [vmem:[%s2709_s5 + $0x30] sm:$0xff]  ;;  %v350_v32 = vld [vmem:[%s2709_s5 + $0x38] sm:$0xff] }
 0x508   : > { %948 = vst.msk [vmem:[#allocation2 + $0x60] sm:$0xff] %vm2412_vm6, %v933_v6  ;;  %v928_v9 = vrot.slane %v919_v8, 4 }
 0x50a   : > { %v938_v10 = vsel %vm930_vm9, %v928_v9, %v929_v7  ;;  %v917_v46 = vpop.permute.xlu0 %916 }
 0x50b   : > { %v939_v11 = vsel %vm932_vm10, %v919_v8, %v938_v10  ;;  %v927_v12 = vrot.slane %v917_v46, 4  ;;  %953 = vst.msk [vmem:[#allocation2 + $0x80] sm:$0xf] %vm308_vm1, %v917_v46  ;;  %v915_v13 = vpop.permute.xlu1 %914 }
 0x50c   : > { %954 = vst.msk [vmem:[#allocation2 + $0x84] sm:$0xff] %vm2412_vm6, %v939_v11  ;;  %v926_v14 = vrot.slane %v915_v13, 4 }
 0x50e   : > { %v936_v15 = vsel %vm930_vm9, %v926_v14, %v927_v12  ;;  %v913_v16 = vpop.permute.xlu0 %912 }
 0x50f   : > { %v937_v17 = vsel %vm932_vm10, %v915_v13, %v936_v15  ;;  %v925_v18 = vrot.slane %v913_v16, 4  ;;  %951 = vst.msk [vmem:[#allocation2 + $0x74] sm:$0xf] %vm308_vm1, %v913_v16  ;;  %v911_v19 = vpop.permute.xlu1 %910 }
 0x510   : > { %952 = vst.msk [vmem:[#allocation2 + $0x78] sm:$0xff] %vm2412_vm6, %v937_v17  ;;  %v924_v21 = vrot.slane %v911_v19, 4 }
 0x512   : > { %v934_v22 = vsel %vm930_vm9, %v924_v21, %v925_v18  ;;  %v824_v23 = vpop.permute.xlu0 %823  ;;  %v2467_v24 = vld [vmem:[#allocation2 + $0x80] ss:$12 sps:$4 sm:$0xff]  }
 0x513   : > { %v935_v25 = vsel %vm932_vm10, %v911_v19, %v934_v22  ;;  %v830_v26 = vrot.slane %v824_v23, 4  ;;  %v822_v27 = vpop.permute.xlu1 %821  ;;  %1129 = vrot.lane.b32.xlu0 %v2467_v24, %s2123_s15 }
 0x514   : > { %950 = vst.msk [vmem:[#allocation2 + $0x6c] sm:$0xff] %vm2412_vm6, %v935_v25 }
 0x515   : > { %v838_v28 = vsel %vm831_vm11, %v830_v26, %v824_v23 }
 0x516   : > { %854 = vst.msk [vmem:[#allocation2 + $0x24] sm:$0xff] %vm2412_vm6, %v838_v28  ;;  %v826_v29 = vpop.permute.xlu0 %825  ;;  %v2477_v31 = vld [vmem:[#allocation2 + $0x68] ss:$12 sps:$4 sm:$0xff]  }
 0x517   : > { %v839_v38 = vsel %vm831_vm11, %v830_v26, %v826_v29  ;;  %v820_v39 = vpop.permute.xlu1 %819  ;;  %v2480_v40 = vld [vmem:[#allocation2 + $0x78] ss:$12 sps:$4 sm:$0xff]   ;;  %v2482_v41 = vld [vmem:[#allocation2 + $0x7c] ss:$12 sps:$4 sm:$0xff]   ;;  %1123 = vrot.lane.b32.xlu1 %v2477_v31, %s2123_s15 }
 0x518   : > { %855 = vst.msk [vmem:[#allocation2 + $0x2c] sm:$0xf] %vm308_vm1, %v839_v38  ;;  %v829_v42 = vrot.slane %v820_v39, 4  ;;  %1290 = vmatprep.subr.bf16.mxu1 %v2482_v41 }
 0x519   : > { %1291 = vmatpush1.bf16.msra.mxu1 %v2480_v40 }
 0x51a   : > { %v836_v43 = vsel %vm831_vm11, %v829_v42, %v820_v39  ;;  %v837_v44 = vsel %vm831_vm11, %v829_v42, %v822_v27  ;;  %v816_v45 = vpop.permute.xlu0 %815 }
 0x51b   : > { %852 = vst.msk [vmem:[#allocation2 + $0x18] sm:$0xff] %vm2412_vm6, %v836_v43  ;;  %v828_v48 = vrot.slane %v816_v45, 4  ;;  %v812_v49 = vpop.permute.xlu1 %811  ;;  %v1956_v50 = vld [vmem:[#allocation2 + $0x64] ss:$12 sps:$4 sm:$0xff]   ;;  %v1958_v51 = vld [vmem:[#allocation2 + $0x60] ss:$12 sps:$4 sm:$0xff]   ;;  %1127 = vrot.lane.b32.xlu1 %v2482_v41, %s2123_s15 }
 0x51c   : > { %853 = vst.msk [vmem:[#allocation2 + $0x20] sm:$0xf] %vm308_vm1, %v837_v44  ;;  %v827_v52 = vrot.slane %v812_v49, 4  ;;  %1121 = vrot.lane.b32.xlu0 %v1956_v50, %s2123_s15  ;;  %1292 = vmatprep.subr.bf16.mxu1 %v1956_v50 }
 0x51d   : > { %v834_v53 = vsel %vm831_vm11, %v828_v48, %v816_v45  ;;  %1293 = vmatpush1.bf16.msra.mxu1 %v1958_v51  ;;  %v1968_v45 = vld [vmem:[#allocation6 + $0x20] sm:$0xff]  }
 0x51e   : > { %850 = vst.msk [vmem:[#allocation2 + $0xc] sm:$0xff] %vm2412_vm6, %v834_v53  ;;  %v832_v54 = vsel %vm831_vm11, %v827_v52, %v812_v49  ;;  %v818_v55 = vpop.permute.xlu0 %817  ;;  %1294 = vmatprep.subr.bf16.mxu1 %v2436_v63  ;;  %v1970_v53 = vld [vmem:[#allocation6 + $0x28] sm:$0xff]  }
 0x51f   : > { %848 = vst.msk [vmem:[#allocation2] sm:$0xff] %vm2412_vm6, %v832_v54  ;;  %v835_v56 = vsel %vm831_vm11, %v828_v48, %v818_v55  ;;  %v814_v57 = vpop.permute.xlu1 %813  ;;  %1125 = vrot.lane.b32.xlu1 %v2480_v40, %s2123_s15 }
 0x520   : > { %851 = vst.msk [vmem:[#allocation2 + $0x14] sm:$0xf] %vm308_vm1, %v835_v56  ;;  %v833_v58 = vsel %vm831_vm11, %v827_v52, %v814_v57  ;;  %1119 = vrot.lane.b32.xlu0 %v1958_v51, %s2123_s15 }
 0x521   : > { %849 = vst.msk [vmem:[#allocation2 + $0x8] sm:$0xf] %vm308_vm1, %v833_v58  ;;  %1295 = vmatpush1.bf16.msra.mxu1 %v2444_v1 }
 0x522   : > { %1296 = vmatprep.subr.bf16.mxu1 %v2442_v0  ;;  %v1962_v59 = vld [vmem:[#allocation2 + $0x1c] ss:$12 sps:$4 sm:$0xff]   ;;  %v1960_v34 = vld [vmem:[#allocation2 + $0x18] ss:$12 sps:$4 sm:$0xff]   ;;  %v1118_v7 = vpop.permute.xlu0 %1117 }
 0x523   : > { %1111 = vrot.lane.b32.xlu1 %v1959_v47, %s2123_s15  ;;  %v1963_v33 = vld [vmem:[#allocation2 + $0x20] ss:$12 sps:$4 sm:$0xff]   ;;  %v1116_v6 = vpop.permute.xlu1 %1115 }
 0x524   : > { %1107 = vrot.lane.b32.xlu0 %v2432_v35, %s2123_s15  ;;  %v1139_v22 = vsel %vm1131_vm13, %v1116_v6, %v1118_v7  ;;  %v1976_v7 = vld [vmem:[#allocation6 + $0x40] sm:$0xff]  }
 0x525   : > { %1297 = vmatpush1.bf16.msra.mxu1 %v2432_v35 }
 0x526   : > { %1298 = vmatprep.subr.bf16.mxu1 %v1962_v59  ;;  %v1966_v60 = vld [vmem:[#allocation2 + $0x4] ss:$12 sps:$4 sm:$0xff]   ;;  %v1964_v61 = vld [vmem:[#allocation2] ss:$12 sps:$4 sm:$0xff]   ;;  %v1110_v9 = vpop.permute.xlu0 %1109 }
 0x527   : > { %1103 = vrot.lane.b32.xlu1 %v1962_v59, %s2123_s15  ;;  %v1114_v8 = vpop.permute.xlu1 %1113 }
 0x528   : > { %1105 = vrot.lane.b32.xlu0 %v1963_v33, %s2123_s15  ;;  %v1967_v36 = vld [vmem:[#allocation2 + $0x8] ss:$12 sps:$4 sm:$0xff]  }
 0x529   : > { %1299 = vmatpush1.bf16.msra.mxu1 %v1960_v34 }
 0x52a   : > { %1300 = vmatprep.subr.bf16.mxu1 %v1966_v60 }
 0x52b   : > { %1101 = vrot.lane.b32.xlu1 %v1960_v34, %s2123_s15 }
 0x52c   : > { %1097 = vrot.lane.b32.xlu0 %v1966_v60, %s2123_s15 }
 0x52d   : > { %1301 = vmatpush1.bf16.msra.mxu1 %v1964_v61 }
 0x52f   : > { %1099 = vrot.lane.b32.xlu1 %v1967_v36, %s2123_s15 }
 0x530   : > { %1095 = vrot.lane.b32.xlu0 %v1964_v61, %s2123_s15  ;;  %1792 = vmatmul.mubr.msk.bf16.vlgmr.msra.gmra.mxu1 %vm1156_vm12, %v1969_v62  ;;  %s2040_s15 = scalar_lea.vmem %s2657_s8, 2048 }
 0x531   : > { %1328 = vmatprep.mubr.bf16.mxu1 %v2116_v20  ;;  %p2041_p10 = scmp.ne.s32.totalorder %s2657_s8, %s2040_s15 }
 0x533   : > { %1416 = vrot.lane.b32.xlu1 %v2477_v31, %s2124_s16  ;;  %p2042_p12 = pnand %p2041_p10, %p2205_p5 }
 0x534   : > { %1422 = vrot.lane.b32.xlu0 %v2467_v24, %s2124_s16  ;;  %v1138_v24 = vsel %vm1131_vm13, %v1114_v8, %v1116_v6  ;;  %v1977_v8 = vld [vmem:[#allocation6 + $0x50] sm:$0xff]  }
 0x535   : > { %p2043_p8 = pneg %p2042_p12 }
 0x537   : > { %1408 = vrot.lane.b32.xlu1 %v2436_v63, %s2124_s16  ;;  %v1975_v63 = vld [vmem:[#allocation6 + $0x18] sm:$0xff]  }
 0x538   : > { %1414 = vrot.lane.b32.xlu0 %v1956_v50, %s2124_s16  ;;  %1793 = vmatmul.mubr.msk.bf16.gmra.mxu1 %vm1156_vm12, %v1971_v2 }
 0x539   : > { %1338 = vmatprep.mubr.bf16.mxu1 %v2116_v20 }
 0x53b   : > { %1420 = vrot.lane.b32.xlu1 %v2482_v41, %s2124_s16 }
 0x53c   : > { %1412 = vrot.lane.b32.xlu0 %v1958_v51, %s2124_s16 }
 0x53f   : > { %1418 = vrot.lane.b32.xlu1 %v2480_v40, %s2124_s16 }
 0x540   : > { %1410 = vrot.lane.b32.xlu0 %v2434_v37, %s2124_s16  ;;  %1794 = vmatmul.mubr.msk.bf16.gmra.mxu1 %vm1156_vm12, %v1973_v3  ;;  %v343_v37 = vld [vmem:[%s2709_s5] sm:$0xff] }
 0x541   : > { %1348 = vmatprep.mubr.bf16.mxu1 %v2116_v20 }
 0x543   : > { %1406 = vrot.lane.b32.xlu1 %v2444_v1, %s2124_s16  ;;  %v346_v1 = vld [vmem:[%s2709_s5 + $0x18] sm:$0xff] }
 0x544   : > { %1402 = vrot.lane.b32.xlu0 %v2442_v0, %s2124_s16  ;;  %v344_v0 = vld [vmem:[%s2709_s5 + $0x8] sm:$0xff] }
 0x547   : > { %1404 = vrot.lane.b32.xlu1 %v1959_v47, %s2124_s16 }
 0x548   : > { %1400 = vrot.lane.b32.xlu0 %v2432_v35, %s2124_s16  ;;  %1795 = vmatmul.mubr.msk.bf16.gmra.mxu1 %vm1156_vm12, %v1975_v63  ;;  %v345_v35 = vld [vmem:[%s2709_s5 + $0x10] sm:$0xff] }
 0x549   : > { %1513 = vmatprep.mubr.bf16.mxu1 %v2116_v20 }
 0x54b   : > { %1396 = vrot.lane.b32.xlu1 %v1962_v59, %s2124_s16 }
 0x54c   : > { %1398 = vrot.lane.b32.xlu0 %v1963_v33, %s2124_s16  ;;  %v1972_v33 = vld [vmem:[#allocation6 + $0x30] sm:$0xff]  }
 0x54f   : > { %1394 = vrot.lane.b32.xlu1 %v1960_v34, %s2124_s16 }
 0x550   : > { %1390 = vrot.lane.b32.xlu0 %v1966_v60, %s2124_s16 }
 0x553   : > { %1392 = vrot.lane.b32.xlu1 %v1967_v36, %s2124_s16 }
 0x554   : > { %1388 = vrot.lane.b32.xlu0 %v1964_v61, %s2124_s16  ;;  %s2125_s16 = smov [#allocation8]  }
 0x555   : > { %s2044_s18 = sshll.u32 %s2125_s16, 4  ;;  %s2045_s18 = int_to_ptr.vmem [resolvable:$false] %s2044_s18 }
 0x556   : > { %s2046_s13 = scalar_lea.vmem %s2045_s18, 4096  ;;  %p2047_p11 = scmp.lt.s32.totalorder %s2657_s8, %s2045_s18 }
 0x557   : > { %1552 = vperm.xlu1 %1946, %v343_v37   ;;  %v1974_v37 = vld [vmem:[#allocation6 + $0x38] sm:$0xff]   ;;  %p2048_p0 = scmp.lt.s32.totalorder %s2046_s13, %s2040_s15 }
 0x558   : > { %1557 = vperm.xlu0 %1945, %v344_v0  }
 0x559   : > { %p2049_p1 = por %p2048_p0, %p2047_p11 }
 0x55b   : > { %1562 = vperm.xlu1 %1946, %v345_v35   ;;  %p2050_p3 = pnand %p2049_p1, %p2043_p8 }
 0x55c   : > { %1567 = vperm.xlu0 %1945, %v346_v1  }
 0x55f   : > { %1572 = vperm.xlu1 %1946, %v347_v4  }
 0x560   : > { %1577 = vperm.xlu0 %1945, %v348_v30  }
 0x563   : > { %1582 = vperm.xlu1 %1946, %v349_v5  }
 0x564   : > { %1587 = vperm.xlu0 %1945, %v350_v32  }
 0x585   : > { %v1130_v46 = vpop.permute.xlu0 %1129 }
 0x589   : > { %v1124_v10 = vpop.permute.xlu1 %1123 }
 0x58d   : > { %v1128_v11 = vpop.permute.xlu1 %1127 }
 0x58e   : > { %v1122_v12 = vpop.permute.xlu0 %1121  ;;  %v1143_v13 = vsel %vm1131_vm13, %v1128_v11, %v1130_v46 }
 0x58f   : > { %1173 = vmatprep.subr.bf16.mxu0 %v1143_v13  ;;  %v1141_v17 = vsel %vm1131_vm13, %v1122_v12, %v1124_v10  ;;  %v1979_v10 = vld [vmem:[#allocation6 + $0x58] sm:$0xff]  }
 0x591   : > { %v1126_v14 = vpop.permute.xlu1 %1125 }
 0x592   : > { %v1142_v15 = vsel %vm1131_vm13, %v1126_v14, %v1128_v11  ;;  %v1120_v16 = vpop.permute.xlu0 %1119 }
 0x593   : > { %1174 = vmatpush1.bf16.msra.mxu0 %v1142_v15  ;;  %v1140_v19 = vsel %vm1131_vm13, %v1120_v16, %v1122_v12 }
 0x594   : > { %1175 = vmatprep.subr.bf16.mxu0 %v1141_v17 }
 0x595   : > { %v1112_v18 = vpop.permute.xlu1 %1111 }
 0x596   : > { %v1108_v21 = vpop.permute.xlu0 %1107  ;;  %v1137_v26 = vsel %vm1131_vm13, %v1110_v9, %v1112_v18 }
 0x597   : > { %1176 = vmatpush1.bf16.msra.mxu0 %v1140_v19  ;;  %v1136_v28 = vsel %vm1131_vm13, %v1108_v21, %v1110_v9  ;;  %v1978_v9 = vld [vmem:[#allocation6 + $0x48] sm:$0xff]  }
 0x598   : > { %1177 = vmatprep.subr.bf16.mxu0 %v1139_v22 }
 0x599   : > { %v1104_v23 = vpop.permute.xlu1 %1103 }
 0x59a   : > { %v1106_v25 = vpop.permute.xlu0 %1105 }
 0x59b   : > { %1178 = vmatpush1.bf16.msra.mxu0 %v1138_v24  ;;  %v1135_v31 = vsel %vm1131_vm13, %v1104_v23, %v1106_v25 }
 0x59c   : > { %1179 = vmatprep.subr.bf16.mxu0 %v1137_v26 }
 0x59d   : > { %v1102_v27 = vpop.permute.xlu1 %1101 }
 0x59e   : > { %v1098_v29 = vpop.permute.xlu0 %1097  ;;  %v1134_v39 = vsel %vm1131_vm13, %v1102_v27, %v1104_v23 }
 0x59f   : > { %1180 = vmatpush1.bf16.msra.mxu0 %v1136_v28 }
 0x5a0   : > { %1181 = vmatprep.subr.bf16.mxu0 %v1135_v31 }
 0x5a1   : > { %v1100_v38 = vpop.permute.xlu1 %1099 }
 0x5a2   : > { %v1096_v40 = vpop.permute.xlu0 %1095  ;;  %v1133_v41 = vsel %vm1131_vm13, %v1098_v29, %v1100_v38 }
 0x5a3   : > { %1182 = vmatpush1.bf16.msra.mxu0 %v1134_v39  ;;  %v1132_v43 = vsel %vm1131_vm13, %v1096_v40, %v1098_v29 }
 0x5a4   : > { %1183 = vmatprep.subr.bf16.mxu0 %v1133_v41 }
 0x5a5   : > { %v1417_v42 = vpop.permute.xlu1 %1416 }
 0x5a6   : > { %v1423_v44 = vpop.permute.xlu0 %1422 }
 0x5a7   : > { %1184 = vmatpush1.bf16.msra.mxu0 %v1132_v43 }
 0x5a9   : > { %v1409_v48 = vpop.permute.xlu1 %1408 }
 0x5aa   : > { %v1415_v49 = vpop.permute.xlu0 %1414  ;;  %1784 = vmatmul.mubr.msk.bf16.vlgmr.msra.gmra.mxu0 %vm1156_vm12, %v1968_v45 }
 0x5ab   : > { %1211 = vmatprep.mubr.bf16.mxu0 %v2116_v20  ;;  %v1434_v57 = vsel %vm1156_vm12, %v1415_v49, %v1417_v42 }
 0x5ad   : > { %v1421_v50 = vpop.permute.xlu1 %1420 }
 0x5ae   : > { %v1413_v51 = vpop.permute.xlu0 %1412  ;;  %v1436_v52 = vsel %vm1156_vm12, %v1421_v50, %v1423_v44 }
 0x5af   : > { %1465 = vmatprep.subr.bf16.mxu0 %v1436_v52  ;;  %1859 = vmatprep.subr.bf16.mxu1 %v1436_v52  ;;  %v1433_v47 = vsel %vm1156_vm12, %v1413_v51, %v1415_v49 }
 0x5b1   : > { %v1419_v54 = vpop.permute.xlu1 %1418 }
 0x5b2   : > { %v1435_v55 = vsel %vm1156_vm12, %v1419_v54, %v1421_v50  ;;  %v1411_v56 = vpop.permute.xlu0 %1410  ;;  %1785 = vmatmul.mubr.msk.bf16.gmra.mxu0 %vm1156_vm12, %v1970_v53 }
 0x5b3   : > { %1466 = vmatpush1.bf16.msra.mxu0 %v1435_v55  ;;  %1865 = vmatpush1.bf16.msra.mxu1 %v1435_v55  ;;  %v1432_v34 = vsel %vm1156_vm12, %v1409_v48, %v1411_v56 }
 0x5b4   : > { %1467 = vmatprep.subr.bf16.mxu0 %v1434_v57  ;;  %1860 = vmatprep.subr.bf16.mxu1 %v1434_v57 }
 0x5b5   : > { %v1407_v58 = vpop.permute.xlu1 %1406  ;;  %1221 = vmatprep.mubr.bf16.mxu0 %v2116_v20 }
 0x5b6   : > { %v1403_v59 = vpop.permute.xlu0 %1402  ;;  %v1431_v61 = vsel %vm1156_vm12, %v1407_v58, %v1409_v48 }
 0x5b7   : > { %1468 = vmatpush1.bf16.msra.mxu0 %v1433_v47  ;;  %1866 = vmatpush1.bf16.msra.mxu1 %v1433_v47 }
 0x5b8   : > { %1469 = vmatprep.subr.bf16.mxu0 %v1432_v34  ;;  %1861 = vmatprep.subr.bf16.mxu1 %v1432_v34 }
 0x5b9   : > { %v1405_v60 = vpop.permute.xlu1 %1404 }
 0x5ba   : > { %v1401_v62 = vpop.permute.xlu0 %1400  ;;  %1786 = vmatmul.mubr.msk.bf16.gmra.mxu0 %vm1156_vm12, %v1972_v33  ;;  %v1430_v36 = vsel %vm1156_vm12, %v1403_v59, %v1405_v60 }
 0x5bb   : > { %1470 = vmatpush1.bf16.msra.mxu0 %v1431_v61  ;;  %1867 = vmatpush1.bf16.msra.mxu1 %v1431_v61  ;;  %v1429_v3 = vsel %vm1156_vm12, %v1401_v62, %v1403_v59 }
 0x5bc   : > { %1471 = vmatprep.subr.bf16.mxu0 %v1430_v36  ;;  %1862 = vmatprep.subr.bf16.mxu1 %v1430_v36 }
 0x5bd   : > { %v1397_v2 = vpop.permute.xlu1 %1396  ;;  %1231 = vmatprep.mubr.bf16.mxu0 %v2116_v20 }
 0x5be   : > { %v1399_v63 = vpop.permute.xlu0 %1398 }
 0x5bf   : > { %1472 = vmatpush1.bf16.msra.mxu0 %v1429_v3  ;;  %1868 = vmatpush1.bf16.msra.mxu1 %v1429_v3  ;;  %v1428_v0 = vsel %vm1156_vm12, %v1397_v2, %v1399_v63 }
 0x5c0   : > { %1473 = vmatprep.subr.bf16.mxu0 %v1428_v0  ;;  %1863 = vmatprep.subr.bf16.mxu1 %v1428_v0 }
 0x5c1   : > { %v1395_v35 = vpop.permute.xlu1 %1394 }
 0x5c2   : > { %v1427_v1 = vsel %vm1156_vm12, %v1395_v35, %v1397_v2  ;;  %v1391_v4 = vpop.permute.xlu0 %1390  ;;  %1787 = vmatmul.mubr.msk.bf16.gmra.mxu0 %vm1156_vm12, %v1974_v37 }
 0x5c3   : > { %1474 = vmatpush1.bf16.msra.mxu0 %v1427_v1  ;;  %1869 = vmatpush1.bf16.msra.mxu1 %v1427_v1 }
 0x5c4   : > { %1493 = vmatprep.mubr.bf16.mxu0 %v2116_v20 }
 0x5c5   : > { %v1393_v30 = vpop.permute.xlu1 %1392 }
 0x5c6   : > { %v1389_v5 = vpop.permute.xlu0 %1388  ;;  %v1426_v32 = vsel %vm1156_vm12, %v1391_v4, %v1393_v30 }
 0x5c7   : > { %v1425_v6 = vsel %vm1156_vm12, %v1389_v5, %v1391_v4  ;;  %1475 = vmatprep.subr.bf16.mxu0 %v1426_v32  ;;  %1864 = vmatprep.subr.bf16.mxu1 %v1426_v32 }
 0x5c8   : > { %1476 = vmatpush1.bf16.msra.mxu0 %v1425_v6  ;;  %1870 = vmatpush1.bf16.msra.mxu1 %v1425_v6 }
 0x5cb   : > { %1800 = vmatmul.mubr.msk.bf16.vlgmr.msra.gmra.mxu0 %vm1156_vm12, %v1976_v7  ;;  %1802 = vmatmul.mubr.msk.bf16.vlgmr.msra.gmra.mxu1 %vm1156_vm12, %v1977_v8 }
 0x5cc   : > { %1503 = vmatprep.mubr.bf16.mxu0 %v2116_v20  ;;  %1523 = vmatprep.mubr.bf16.mxu1 %v2116_v20 }
 0x5d2   : > { %v1553_v41 = vpop.permute.xlu1 %1552 }
 0x5d3   : > { %1801 = vmatmul.mubr.msk.bf16.gmra.mxu0 %vm1156_vm12, %v1978_v9  ;;  %1803 = vmatmul.mubr.msk.bf16.gmra.mxu1 %vm1156_vm12, %v1979_v10  ;;  %v1558_v48 = vpop.permute.xlu0 %1557 }
 0x5d6   : > { %v2612_v50 = vpop.permute.xlu1 %1562 }
 0x5d7   : > { %v2619_v58 = vpop.permute.xlu0 %1567 }
 0x5da   : > { %v1573_v47 = vpop.permute.xlu1 %1572 }
 0x5f0   : > { %v1320_v46 = vpop.f32.mrf.mxu1 }
 0x5f2   : > { %v1322_v11 = vpop.f32.mrf.mxu1 }
 0x5f4   : > { %v1324_v12 = vpop.f32.mrf.mxu1 }
 0x5f6   : > { %v1326_v13 = vpop.f32.mrf.mxu1 }
 0x5f8   : > { %v1330_v14 = vpop.f32.mrf.mxu1 }
 0x5fa   : > { %v2602_v15 = vpop.f32.mrf.mxu1 }
 0x5fc   : > { %v2604_v16 = vpop.f32.mrf.mxu1 }
 0x5fe   : > { %v2606_v17 = vpop.f32.mrf.mxu1 }
 0x600   : > { %v1340_v20 = vpop.f32.mrf.mxu1 }
 0x602   : > { %v1342_v23 = vpop.f32.mrf.mxu1 }
 0x604   : > { %v1344_v26 = vpop.f32.mrf.mxu1 }
 0x606   : > { %v1346_v29 = vpop.f32.mrf.mxu1 }
 0x608   : > { %v1350_v39 = vpop.f32.mrf.mxu1 }
 0x60a   : > { %v2610_v43 = vpop.f32.mrf.mxu1 }
 0x60c   : > { %v1354_v49 = vpop.f32.mrf.mxu1 }
 0x60e   : > { %v2616_v53 = vpop.f32.mrf.mxu1 }
 0x66a   : > { %v1203_v18 = vpop.f32.mrf.mxu0 }
 0x66b   : > { %v1321_v54 = vadd.f32 %v1320_v46, %v1203_v18 }
 0x66c   : > { %v1205_v19 = vpop.f32.mrf.mxu0 }
 0x66d   : > { %v1323_v59 = vadd.f32 %v1322_v11, %v1205_v19  ;;  %v1578_v19 = vpop.permute.xlu0 %1577 }
 0x66e   : > { %v1207_v21 = vpop.f32.mrf.mxu0 }
 0x66f   : > { %v1325_v37 = vadd.f32 %v1324_v12, %v1207_v21 }
 0x670   : > { %v1209_v22 = vpop.f32.mrf.mxu0 }
 0x671   : > { %v1327_v0 = vadd.f32 %v1326_v13, %v1209_v22 }
 0x672   : > { %v1213_v24 = vpop.f32.mrf.mxu0 }
 0x673   : > { %v1331_v8 = vadd.f32 %v1330_v14, %v1213_v24 }
 0x674   : > { %v1215_v25 = vpop.f32.mrf.mxu0 }
 0x675   : > { %v1333_v14 = vadd.f32 %v2602_v15, %v1215_v25 }
 0x676   : > { %v1217_v27 = vpop.f32.mrf.mxu0 }
 0x677   : > { %v1335_v22 = vadd.f32 %v2604_v16, %v1217_v27 }
 0x678   : > { %v2608_v28 = vpop.f32.mrf.mxu0 }
 0x67a   : > { %v1223_v31 = vpop.f32.mrf.mxu0 }
 0x67b   : > { %v1341_v55 = vadd.f32 %v1340_v20, %v1223_v31  ;;  %v1583_v31 = vpop.permute.xlu1 %1582 }
 0x67c   : > { %v1225_v38 = vpop.f32.mrf.mxu0 }
 0x67d   : > { %v1343_v33 = vadd.f32 %v1342_v23, %v1225_v38 }
 0x67e   : > { %v1227_v40 = vpop.f32.mrf.mxu0 }
 0x67f   : > { %v1345_v35 = vadd.f32 %v1344_v26, %v1227_v40 }
 0x680   : > { %v1229_v42 = vpop.f32.mrf.mxu0 }
 0x681   : > { %v1347_v1 = vadd.f32 %v1346_v29, %v1229_v42 }
 0x682   : > { %v1233_v44 = vpop.f32.mrf.mxu0 }
 0x683   : > { %v1351_v9 = vadd.f32 %v1350_v39, %v1233_v44 }
 0x684   : > { %v1235_v45 = vpop.f32.mrf.mxu0 }
 0x685   : > { %v1353_v42 = vadd.f32 %v2610_v43, %v1235_v45 }
 0x686   : > { %v1237_v51 = vpop.f32.mrf.mxu0 }
 0x687   : > { %v1355_v44 = vadd.f32 %v1354_v49, %v1237_v51 }
 0x688   : > { %v2614_v52 = vpop.f32.mrf.mxu0 }
 0x68b   : > { %v1495_v56 = vpop.f32.mrf.mxu0  ;;  %v1515_v57 = vpop.f32.mrf.mxu1 }
 0x68c   : > { %v1534_v34 = vadd.f32 %v1495_v56, %v1321_v54  ;;  %v1542_v60 = vadd.f32 %v1515_v57, %v1341_v55 }
 0x68d   : > { %v1497_v61 = vpop.f32.mrf.mxu0  ;;  %v1517_v62 = vpop.f32.mrf.mxu1 }
 0x68e   : > { %v1590_v36 = vadd.f32 %v1553_v41, %v1534_v34  ;;  %v1598_v2 = vadd.f32 %v1573_v47, %v1542_v60  ;;  %v1535_v3 = vadd.f32 %v1497_v61, %v1323_v59  ;;  %v1543_v63 = vadd.f32 %v1517_v62, %v1343_v33  ;;  %v1588_v59 = vpop.permute.xlu0 %1587 }
 0x68f   : > { %v1499_v4 = vpop.f32.mrf.mxu0  ;;  %v1519_v30 = vpop.f32.mrf.mxu1 }
 0x690   : > { %v1606_v5 = vmax.f32 %v1590_v36, 0.0  ;;  %v1614_v32 = vmax.f32 %v1598_v2, 0.0  ;;  %v1591_v6 = vadd.f32 %v1553_v41, %v1535_v3  ;;  %v1599_v7 = vadd.f32 %v1573_v47, %v1543_v63 }
 0x691   : > { %v1536_v10 = vadd.f32 %v1499_v4, %v1325_v37  ;;  %v1544_v46 = vadd.f32 %v1519_v30, %v1345_v35  ;;  %v1501_v11 = vpop.f32.mrf.mxu0  ;;  %v1521_v18 = vpop.f32.mrf.mxu1  ;;  %v1357_v47 = vadd.f32 %v2616_v53, %v2614_v52 }
 0x692   : > { %1622 = vst [vmem:[%s2623_s22] sm:$0xff] %v1606_v5  ;;  %1630 = vst [vmem:[%s2623_s22 + $0x40] sm:$0xff] %v1614_v32  ;;  %v1607_v12 = vmax.f32 %v1591_v6, 0.0  ;;  %v1615_v13 = vmax.f32 %v1599_v7, 0.0  ;;  %v1537_v20 = vadd.f32 %v1501_v11, %v1327_v0  ;;  %v1545_v21 = vadd.f32 %v1521_v18, %v1347_v1 }
 0x693   : > { %v1592_v23 = vadd.f32 %v1558_v48, %v1536_v10  ;;  %v1600_v24 = vadd.f32 %v1578_v19, %v1544_v46  ;;  %v1505_v26 = vpop.f32.mrf.mxu0  ;;  %v1525_v29 = vpop.f32.mrf.mxu1 }
 0x694   : > { %1623 = vst [vmem:[%s2623_s22 + $0x8] sm:$0xff] %v1607_v12  ;;  %1631 = vst [vmem:[%s2623_s22 + $0x48] sm:$0xff] %v1615_v13  ;;  %v1593_v38 = vadd.f32 %v1558_v48, %v1537_v20  ;;  %v1601_v39 = vadd.f32 %v1578_v19, %v1545_v21  ;;  %v1538_v40 = vadd.f32 %v1505_v26, %v1331_v8 }
 0x695   : > { %v1546_v41 = vadd.f32 %v1525_v29, %v1351_v9  ;;  %v1608_v54 = vmax.f32 %v1592_v23, 0.0  ;;  %v1616_v15 = vmax.f32 %v1600_v24, 0.0  ;;  %v1507_v16 = vpop.f32.mrf.mxu0  ;;  %v1527_v25 = vpop.f32.mrf.mxu1  ;;  %v1337_v48 = vadd.f32 %v2606_v17, %v2608_v28 }
 0x696   : > { %v1609_v27 = vmax.f32 %v1593_v38, 0.0  ;;  %v1617_v55 = vmax.f32 %v1601_v39, 0.0  ;;  %v1594_v56 = vadd.f32 %v2612_v50, %v1538_v40  ;;  %v1539_v43 = vadd.f32 %v1507_v16, %v1333_v14 }
 0x697   : > { %v1602_v57 = vadd.f32 %v1583_v31, %v1546_v41  ;;  %1624 = vst [vmem:[%s2623_s22 + $0x10] sm:$0xff] %v1608_v54  ;;  %1632 = vst [vmem:[%s2623_s22 + $0x50] sm:$0xff] %v1616_v15  ;;  %v1547_v45 = vadd.f32 %v1527_v25, %v1353_v42  ;;  %v1509_v49 = vpop.f32.mrf.mxu0  ;;  %v1529_v51 = vpop.f32.mrf.mxu1 }
 0x698   : > { %1625 = vst [vmem:[%s2623_s22 + $0x18] sm:$0xff] %v1609_v27  ;;  %1633 = vst [vmem:[%s2623_s22 + $0x58] sm:$0xff] %v1617_v55  ;;  %v1610_v33 = vmax.f32 %v1594_v56, 0.0  ;;  %v1540_v60 = vadd.f32 %v1509_v49, %v1335_v22  ;;  %v1548_v17 = vadd.f32 %v1529_v51, %v1355_v44  ;;  %v1595_v28 = vadd.f32 %v2612_v50, %v1539_v43 }
 0x699   : > { %v1618_v34 = vmax.f32 %v1602_v57, 0.0  ;;  %v1603_v52 = vadd.f32 %v1583_v31, %v1547_v45  ;;  %v1511_v53 = vpop.f32.mrf.mxu0  ;;  %v1531_v61 = vpop.f32.mrf.mxu1 }
 0x69a   : > { %1626 = vst [vmem:[%s2623_s22 + $0x20] sm:$0xff] %v1610_v33  ;;  %v1596_v62 = vadd.f32 %v2619_v58, %v1540_v60  ;;  %v1604_v36 = vadd.f32 %v1588_v59, %v1548_v17  ;;  %v1541_v2 = vadd.f32 %v1511_v53, %v1337_v48  ;;  %v1549_v3 = vadd.f32 %v1531_v61, %v1357_v47 }
 0x69b   : > { %1634 = vst [vmem:[%s2623_s22 + $0x60] sm:$0xff] %v1618_v34  ;;  %v1611_v63 = vmax.f32 %v1595_v28, 0.0  ;;  %v1619_v37 = vmax.f32 %v1603_v52, 0.0 }
 0x69c   : > { %v1612_v50 = vmax.f32 %v1596_v62, 0.0  ;;  %v1620_v0 = vmax.f32 %v1604_v36, 0.0  ;;  %v1597_v35 = vadd.f32 %v2619_v58, %v1541_v2  ;;  %v1605_v1 = vadd.f32 %v1588_v59, %v1549_v3 }
 0x69d   : > { %1627 = vst [vmem:[%s2623_s22 + $0x28] sm:$0xff] %v1611_v63  ;;  %1635 = vst [vmem:[%s2623_s22 + $0x68] sm:$0xff] %v1619_v37 }
 0x69e   : > { %1628 = vst [vmem:[%s2623_s22 + $0x30] sm:$0xff] %v1612_v50  ;;  %1636 = vst [vmem:[%s2623_s22 + $0x70] sm:$0xff] %v1620_v0  ;;  %v1613_v4 = vmax.f32 %v1597_v35, 0.0  ;;  %v1621_v30 = vmax.f32 %v1605_v1, 0.0 }
 0x6a0   : > { %1629 = vst [vmem:[%s2623_s22 + $0x38] sm:$0xff] %v1613_v4  ;;  %1637 = vst [vmem:[%s2623_s22 + $0x78] sm:$0xff] %v1621_v30 }
 0x6a1   : > { %2053 = shalt.err (!%p2050_p3)
}
 0x6a2   : > { %s2054_s19 = scalar_lea.hbm %s2653_s17, 2048  ;;  %s2058_s22 = scalar_lea.hbm %s2711_s7, 4096 }
 0x6a3   : > { %p2055_p2 = scmp.ne.s32.totalorder %s2653_s17, %s2054_s19  ;;  %p2059_p6 = scmp.lt.s32.totalorder %s2653_s17, %s2711_s7 }
 0x6a4   : > { %p2060_p9 = scmp.lt.s32.totalorder %s2058_s22, %s2054_s19 }
 0x6a5   : > { %p2056_p4 = pnand %p2055_p2, %p2205_p5 }
 0x6a6   : > { %p2061_p7 = por %p2060_p9, %p2059_p6 }
 0x6a7   : > { %p2057_p13 = pneg %p2056_p4 }
 0x6a9   : > { %p2062_p10 = pnand %p2061_p7, %p2057_p13 }
 0x6ab   : > { %2065 = shalt.err (!%p2062_p10)
}
 0x6ac   : > { %s2126_s14 = smov 256  }
 0x6ad   : > { %1879 = dma.vmem_to_hbm [thread:$0]  (%p2205_p5), %s2657_s8, 2048, %s2653_s17, %s2663_s28, %s2126_s14, %s2126_s14, %s2118_s29  }
 0x6ae PF: > { %p1896_p12 = scmp.ge.s32.totalorder %s2108_s27, 2  ;;  %s1667_s15 = sand.u32 1, %s2096_s24  }
 0x6af   : > { %p2723_p8 = scmp.ne.s32.totalorder %s2714_s12, 0  ;;  %s1668_s16 = scalar_lea.sflag [#allocation5], %s1667_s15 }
 0x6b1   : > { %p1889_p11 = pnand %p1896_p12, %p2723_p8 }
 0x6b3   : > { %p1890_p0 = pneg %p1889_p11 }
 0x6b5   : > { %2091 = dma.done.wait (%p1890_p0), %s1668_s16, 2048  }
 0x6b6   : > { %2093 = vsyncadd (%p1890_p0), %s1668_s16, 4294965248  ;;  %p19_p1 = scmp.ge.s32.totalorder %s2192_s30, 4   ;;  %s2724_s24 = smov %s2100_s25 }
 0x6b7   : > { %s2725_s25 = smov %s2104_s26  ;;  %s2726_s26 = smov %s2203_s10 }
 0x6b8   : > { %s2727_s27 = smov %s2192_s30  ;;  %21 = sbr.rel (!%p19_p1) target bundleno = 5 (0x5), region = 94 }
 0x6bd   :  { %1673 = vsyncpa [#allocation4], 1 }
 0x6be   :  { %1675 = vsyncpa [#allocation4 + $0x1], 1 }
 0x6bf   :  { %1676 = vsyncpa [#allocation7], 1 }
 0x6c0   :  { %1677 = vsyncpa [#allocation5], 1 }
 0x6c1   :  { %1679 = vsyncpa [#allocation5 + $0x1], 1 }

</bundles_post_ra>
